<compile_context>
chip_gen: v7x
topology: tpu7x:2x2x1
jax: 0.10.0
libtpu: 0.0.40
codegen_flags: <defaults>
</compile_context>

<pallas_src>
import math
import functools

import jax
import jax.numpy as jnp
import numpy as np
from jax.experimental import pallas as pl
from jax.experimental.pallas import tpu as pltpu


def _layer_norm(v, g, b, eps=1e-6):
    mu = jnp.mean(v, axis=-1, keepdims=True)
    var = jnp.mean((v - mu) ** 2, axis=-1, keepdims=True)
    return (v - mu) * jax.lax.rsqrt(var + eps) * g + b


def encoder_layer_kernel(
    x_ref, mask_ref,
    wq_ref, bq_ref, wk_ref, bk_ref, wv_ref, bv_ref, wo_ref, bo_ref,
    ln1_g_ref, ln1_b_ref,
    w1_ref, b1_ref, w2_ref, b2_ref,
    ln2_g_ref, ln2_b_ref,
    out_ref,
    k_sc, v_sc,
    *, num_heads, head_size, alpha, q_block,
):
    f32 = jnp.float32
    bf16 = jnp.bfloat16
    H, hd = num_heads, head_size
    _, S, D = x_ref.shape
    qi = pl.program_id(1)

    # ---- K/V projection: once per batch element, cached in bf16 scratch ----
    # (qi axis is "arbitrary", so a single core owns all qi steps of this b and
    #  the scratch carry across steps is valid.)
    @pl.when(qi == 0)
    def _():
        x_full = x_ref[0].astype(bf16)                                  # (S, D)
        k = jnp.dot(x_full, wk_ref[...], preferred_element_type=f32) + bk_ref[...]
        v = jnp.dot(x_full, wv_ref[...], preferred_element_type=f32) + bv_ref[...]
        k_sc[...] = jnp.transpose(k.reshape(S, H, hd), (1, 0, 2)).astype(bf16)
        v_sc[...] = jnp.transpose(v.reshape(S, H, hd), (1, 0, 2)).astype(bf16)

    # ---- query tile (also the residual), sliced from the resident block ----
    q_start = pl.multiple_of(qi * q_block, q_block)
    x_q = x_ref[0, pl.ds(q_start, q_block), :]                          # (tq, D) f32
    m = mask_ref[0]                                                     # (1, S)  f32

    # wq/bq already carry the 1/sqrt(head_size) scale (folded in the wrapper).
    q = jnp.dot(x_q.astype(bf16), wq_ref[...],
                preferred_element_type=f32) + bq_ref[...]
    q3 = jnp.transpose(q.reshape(q_block, H, hd), (1, 0, 2)).astype(bf16)  # (H,tq,hd)

    # ---- head-batched attention --------------------------------------------
    scores = jnp.einsum('hqd,hkd->hqk', q3, k_sc[...],
                        preferred_element_type=f32)                     # (H,tq,S)

    # additive key-mask bias (0 = keep, -1e30 = masked); large finite value
    # avoids the -inf -> NaN hazard for fully-masked rows.
    bias = (m - 1.0) * 1e30                                             # (1, S)
    scores = scores + bias[None, :, :]

    smax = jnp.max(scores, axis=-1, keepdims=True)
    p = jnp.exp(scores - smax)                                          # (H,tq,S)
    denom = jnp.sum(p, axis=-1, keepdims=True)                          # (H,tq,1)

    ctx = jnp.einsum('hqk,hkd->hqd', p.astype(bf16), v_sc[...],
                     preferred_element_type=f32)                        # (H,tq,hd)
    # deferred softmax normalization: reciprocal runs on the EUP slot.
    ctx = ctx * pl.reciprocal(denom, approx=True)
    ctx2 = jnp.transpose(ctx, (1, 0, 2)).reshape(q_block, D)            # (tq, D)

    attn_out = jnp.dot(ctx2.astype(bf16), wo_ref[...],
                       preferred_element_type=f32) + bo_ref[...]

    # dropout is identity at inference time
    x1 = attn_out + alpha * x_q
    x1 = _layer_norm(x1, ln1_g_ref[...], ln1_b_ref[...])                # post-LN

    # ---- position-wise feed-forward (post-LN) ------------------------------
    h1 = jnp.dot(x1.astype(bf16), w1_ref[...],
                 preferred_element_type=f32) + b1_ref[...]
    h1 = jnp.maximum(h1, 0.0)
    y = jnp.dot(h1.astype(bf16), w2_ref[...],
                preferred_element_type=f32) + b2_ref[...]
    y = y + alpha * x1
    y = _layer_norm(y, ln2_g_ref[...], ln2_b_ref[...])

    out_ref[0] = y.astype(out_ref.dtype)


def _vmem_limit_bytes():
    # Derive the scoped-VMEM limit from the actual chip rather than hard-coding:
    # ~85% of physical capacity leaves headroom for Mosaic internal scratch and
    # semaphores (v7x: ~54 of 64 MiB; v5e/v6e: ~108 of 128 MiB).
    try:
        cap = pltpu.get_tpu_info().vmem_capacity_bytes
    except Exception:
        cap = 128 * 1024 * 1024
    return int(cap * 0.85)


def _pick_q_block(seq_len, vmem_cap):
    # Bigger tiles amortize the ~0.35us per-grid-step overhead.  Cap at 512 on
    # 128 MiB-VMEM chips (v5e/v6e) and 256 on 64 MiB chips (v7x).  On v5e a
    # caller may prefer q_block=128 (4x128x128 MXU) via the explicit argument.
    max_blk = 512 if vmem_cap >= 96 * 1024 * 1024 else 256
    if seq_len <= max_blk:
        return seq_len
    for cand in (512, 256, 128, 64, 32, 16, 8):
        if cand <= max_blk and seq_len % cand == 0:
            return cand
    return seq_len


def transformer_encoder_layer(x, mask_f, params, *, num_heads, alpha=1.0,
                              q_block=None, out_dtype=jnp.float32):
    """x: (B, S, D) float32; mask_f: (B, 1, S) float32 (1=keep, 0=mask)."""
    B, S, D = x.shape
    head_size = D // num_heads
    (wq, bq, wk, bk, wv, bv, wo, bo,
     g1, b1n, w1, b1, w2, b2, g2, b2n) = params
    FF = w1.shape[1]

    # MXU operands in bf16 (halves weight DMA bytes + VMEM residency); biases
    # and LayerNorm params stay f32.  Fold the 1/sqrt(head_size) scale into
    # wq/bq once here instead of multiplying q in every grid step.
    bf = jnp.bfloat16
    scale = 1.0 / math.sqrt(head_size)
    param_list = [
        (wq * scale).astype(bf), bq * scale,
        wk.astype(bf), bk,
        wv.astype(bf), bv,
        wo.astype(bf), bo,
        g1, b1n,
        w1.astype(bf), b1,
        w2.astype(bf), b2,
        g2, b2n,
    ]

    try:
        vmem_cap = pltpu.get_tpu_info().vmem_capacity_bytes
    except Exception:
        vmem_cap = 128 * 1024 * 1024

    if q_block is None:
        q_block = _pick_q_block(S, vmem_cap)
    assert S % q_block == 0
    n_q = S // q_block

    # Weights / biases / mask have constant-per-b index maps: single-buffer
    # them (pl.Buffered(1)) so double-buffering doesn't waste VMEM.
    def weight_spec(p):
        return pl.BlockSpec(p.shape, lambda b, qi, n=p.ndim: (0,) * n,
                            pipeline_mode=pl.Buffered(buffer_count=1))

    in_specs = [
        # full-sequence x: index map constant in qi -> DMA'd once per batch el.
        pl.BlockSpec((1, S, D), lambda b, qi: (b, 0, 0)),
        pl.BlockSpec((1, 1, S), lambda b, qi: (b, 0, 0),
                     pipeline_mode=pl.Buffered(buffer_count=1)),
    ] + [weight_spec(p) for p in param_list]

    kernel = functools.partial(
        encoder_layer_kernel,
        num_heads=num_heads, head_size=head_size, alpha=alpha, q_block=q_block,
    )

    flops = B * (8 * S * D * D + 4 * S * S * D + 4 * S * D * FF)
    transcendentals = B * num_heads * S * S + 3 * B * S
    out_bytes = jnp.dtype(out_dtype).itemsize
    bytes_accessed = int(
        B * S * D * 4 + B * S * 4 + B * S * D * out_bytes
        + (4 * D * D + 2 * D * FF) * 2 + (6 * D + FF) * 4)

    # NOTE: batch axis "parallel" (megacore on v7x), qi axis "arbitrary" so the
    # K/V-in-scratch carry + @pl.when(qi==0) init is valid.  If B == 1 on v7x,
    # one core idles; in that regime prefer the non-carried variant.
    return pl.pallas_call(
        kernel,
        out_shape=jax.ShapeDtypeStruct((B, S, D), out_dtype),
        grid=(B, n_q),
        in_specs=in_specs,
        out_specs=pl.BlockSpec((1, q_block, D), lambda b, qi: (b, qi, 0)),
        scratch_shapes=[
            pltpu.VMEM((num_heads, S, head_size), jnp.bfloat16),  # cached K
            pltpu.VMEM((num_heads, S, head_size), jnp.bfloat16),  # cached V
        ],
        compiler_params=pltpu.CompilerParams(
            dimension_semantics=("parallel", "arbitrary"),
            vmem_limit_bytes=_vmem_limit_bytes()),
        cost_estimate=pl.CostEstimate(
            flops=flops, transcendentals=transcendentals,
            bytes_accessed=bytes_accessed),
    )(x, mask_f, *param_list)


# ---------------- pure-JAX reference (mirrors the PyTorch forward) ------------
def reference(x, mask_bool, p, *, num_heads, alpha=1.0):
    (wq, bq, wk, bk, wv, bv, wo, bo,
     g1, b1ln, w1, b1, w2, b2, g2, b2ln) = p
    B, S, D = x.shape
    hd = D // num_heads

    def ln(v, g, b):
        mu = v.mean(-1, keepdims=True)
        var = ((v - mu) ** 2).mean(-1, keepdims=True)
        return (v - mu) / jnp.sqrt(var + 1e-6) * g + b

    q = x @ wq + bq
    k = x @ wk + bk
    v = x @ wv + bv
    q = q.reshape(B, S, num_heads, hd).transpose(0, 2, 1, 3)
    k = k.reshape(B, S, num_heads, hd).transpose(0, 2, 1, 3)
    v = v.reshape(B, S, num_heads, hd).transpose(0, 2, 1, 3)
    scores = jnp.einsum('bhqd,bhkd->bhqk', q, k) / math.sqrt(hd)
    scores = jnp.where(mask_bool[:, None, :, :], scores, -jnp.inf)
    attn = jax.nn.softmax(scores, axis=-1)
    ctx = jnp.einsum('bhqk,bhkd->bhqd', attn, v)
    ctx = ctx.transpose(0, 2, 1, 3).reshape(B, S, D)
    attn_out = ctx @ wo + bo
    x1 = ln(attn_out + alpha * x, g1, b1ln)
    h1 = jnp.maximum(x1 @ w1 + b1, 0.0)
    y = h1 @ w2 + b2 + alpha * x1
    return ln(y, g2, b2ln)


if __name__ == "__main__":
    B, S, D, H, FF = 2, 8, 32, 4, 64
    key = jax.random.PRNGKey(0)
    keys = jax.random.split(key, 20)

    x = jax.random.normal(keys[0], (B, S, D), dtype=jnp.float32)

    def w(k, shape, s=0.05):
        return jax.random.normal(k, shape, dtype=jnp.float32) * s

    params = (
        w(keys[1], (D, D)), w(keys[2], (1, D)),   # q: weight (in,out), bias
        w(keys[3], (D, D)), w(keys[4], (1, D)),   # k
        w(keys[5], (D, D)), w(keys[6], (1, D)),   # v
        w(keys[7], (D, D)), w(keys[8], (1, D)),   # output proj
        jnp.ones((1, D), jnp.float32), jnp.zeros((1, D), jnp.float32),  # LN1
        w(keys[9], (D, FF)), w(keys[10], (1, FF)),                      # FFN W1,b1
        w(keys[11], (FF, D)), w(keys[12], (1, D)),                      # FFN W2,b2
        jnp.ones((1, D), jnp.float32), jnp.zeros((1, D), jnp.float32),  # LN2
    )

    # mask: batch 0 fully valid, batch 1 valid for first 5 tokens
    lengths = jnp.array([S, 5])
    mask_bool = (jnp.arange(S)[None, :] < lengths[:, None])[:, None, :]  # (B,1,S)
    mask_f = mask_bool.astype(jnp.float32)

    out = transformer_encoder_layer(x, mask_f, params, num_heads=H, alpha=1.0)
    out = jax.block_until_ready(out)

    ref = reference(x, mask_bool, params, num_heads=H, alpha=1.0)
    # bf16 MXU operands with f32 accumulation -> compare at bf16-level tolerance
    np.testing.assert_allclose(np.asarray(out), np.asarray(ref),
                               rtol=2e-2, atol=2e-2)
    print("KERNEL_OK")
</pallas_src>

<mosaic_0001>
module attributes {stable_mosaic.version = 11 : i64} {
  func.func @encoder_layer_kernel(%arg0: i32, %arg1: i32, %arg2: memref<1x8x32xf32, #tpu.memory_space<vmem>>, %arg3: memref<1x1x8xf32, #tpu.memory_space<vmem>>, %arg4: memref<32x32xbf16, #tpu.memory_space<vmem>>, %arg5: memref<1x32xf32, #tpu.memory_space<vmem>>, %arg6: memref<32x32xbf16, #tpu.memory_space<vmem>>, %arg7: memref<1x32xf32, #tpu.memory_space<vmem>>, %arg8: memref<32x32xbf16, #tpu.memory_space<vmem>>, %arg9: memref<1x32xf32, #tpu.memory_space<vmem>>, %arg10: memref<32x32xbf16, #tpu.memory_space<vmem>>, %arg11: memref<1x32xf32, #tpu.memory_space<vmem>>, %arg12: memref<1x32xf32, #tpu.memory_space<vmem>>, %arg13: memref<1x32xf32, #tpu.memory_space<vmem>>, %arg14: memref<32x64xbf16, #tpu.memory_space<vmem>>, %arg15: memref<1x64xf32, #tpu.memory_space<vmem>>, %arg16: memref<64x32xbf16, #tpu.memory_space<vmem>>, %arg17: memref<1x32xf32, #tpu.memory_space<vmem>>, %arg18: memref<1x32xf32, #tpu.memory_space<vmem>>, %arg19: memref<1x32xf32, #tpu.memory_space<vmem>>, %arg20: memref<1x8x32xf32, #tpu.memory_space<vmem>>, %arg21: memref<4x8x8xbf16, #tpu.memory_space<vmem>>, %arg22: memref<4x8x8xbf16, #tpu.memory_space<vmem>>) attributes {dimension_semantics = [#tpu.dimension_semantics<parallel>, #tpu.dimension_semantics<arbitrary>], iteration_bounds = array<i64: 2, 1>, scalar_prefetch = 0 : i64, scratch_operands = 2 : i64, tpu.core_type = #tpu.core_type<tc>, window_params = [{transform_indices = @transform_0, window_bounds = array<i64: 1, 8, 32>}, {pipeline_mode = #tpu.pipeline_mode<synchronous>, transform_indices = @transform_1, window_bounds = array<i64: 1, 1, 8>}, {pipeline_mode = #tpu.pipeline_mode<synchronous>, transform_indices = @transform_2, window_bounds = array<i64: 32, 32>}, {pipeline_mode = #tpu.pipeline_mode<synchronous>, transform_indices = @transform_3, window_bounds = array<i64: 1, 32>}, {pipeline_mode = #tpu.pipeline_mode<synchronous>, transform_indices = @transform_4, window_bounds = array<i64: 32, 32>}, {pipeline_mode = #tpu.pipeline_mode<synchronous>, transform_indices = @transform_5, window_bounds = array<i64: 1, 32>}, {pipeline_mode = #tpu.pipeline_mode<synchronous>, transform_indices = @transform_6, window_bounds = array<i64: 32, 32>}, {pipeline_mode = #tpu.pipeline_mode<synchronous>, transform_indices = @transform_7, window_bounds = array<i64: 1, 32>}, {pipeline_mode = #tpu.pipeline_mode<synchronous>, transform_indices = @transform_8, window_bounds = array<i64: 32, 32>}, {pipeline_mode = #tpu.pipeline_mode<synchronous>, transform_indices = @transform_9, window_bounds = array<i64: 1, 32>}, {pipeline_mode = #tpu.pipeline_mode<synchronous>, transform_indices = @transform_10, window_bounds = array<i64: 1, 32>}, {pipeline_mode = #tpu.pipeline_mode<synchronous>, transform_indices = @transform_11, window_bounds = array<i64: 1, 32>}, {pipeline_mode = #tpu.pipeline_mode<synchronous>, transform_indices = @transform_12, window_bounds = array<i64: 32, 64>}, {pipeline_mode = #tpu.pipeline_mode<synchronous>, transform_indices = @transform_13, window_bounds = array<i64: 1, 64>}, {pipeline_mode = #tpu.pipeline_mode<synchronous>, transform_indices = @transform_14, window_bounds = array<i64: 64, 32>}, {pipeline_mode = #tpu.pipeline_mode<synchronous>, transform_indices = @transform_15, window_bounds = array<i64: 1, 32>}, {pipeline_mode = #tpu.pipeline_mode<synchronous>, transform_indices = @transform_16, window_bounds = array<i64: 1, 32>}, {pipeline_mode = #tpu.pipeline_mode<synchronous>, transform_indices = @transform_17, window_bounds = array<i64: 1, 32>}, {transform_indices = @transform_18, window_bounds = array<i64: 1, 8, 32>}]} {
    %c0_i32 = arith.constant 0 : i32
    %0 = arith.cmpi eq, %arg1, %c0_i32 : i32
    %1 = arith.extui %0 : i1 to i32
    %c0_i32_0 = arith.constant 0 : i32
    %2 = arith.cmpi ne, %1, %c0_i32_0 : i32
    scf.if %2 {
      %c0_60 = arith.constant 0 : index
      %c0_61 = arith.constant 0 : index
      %c0_62 = arith.constant 0 : index
      %120 = vector.load %arg2[%c0_60, %c0_61, %c0_62] : memref<1x8x32xf32, #tpu.memory_space<vmem>>, vector<1x8x32xf32>
      %121 = vector.shape_cast %120 : vector<1x8x32xf32> to vector<8x32xf32>
      %122 = arith.truncf %121 : vector<8x32xf32> to vector<8x32xbf16>
      %c0_63 = arith.constant 0 : index
      %c0_64 = arith.constant 0 : index
      %123 = vector.load %arg6[%c0_63, %c0_64] : memref<32x32xbf16, #tpu.memory_space<vmem>>, vector<32x32xbf16>
      %cst_65 = arith.constant dense<0.000000e+00> : vector<8x32xf32>
      %124 = tpu.matmul %122, %123, %cst_65 {dimension_numbers = #tpu.dot_dimension_numbers<[1], [0], [0], [1], [0, 0, 1, 1], [], []>} : vector<8x32xbf16>, vector<32x32xbf16>, vector<8x32xf32> -> vector<8x32xf32>
      %c0_66 = arith.constant 0 : index
      %c0_67 = arith.constant 0 : index
      %125 = vector.load %arg7[%c0_66, %c0_67] : memref<1x32xf32, #tpu.memory_space<vmem>>, vector<1x32xf32>
      %126 = vector.broadcast %125 : vector<1x32xf32> to vector<8x32xf32>
      %127 = arith.addf %124, %126 : vector<8x32xf32>
      %c0_68 = arith.constant 0 : index
      %c0_69 = arith.constant 0 : index
      %128 = vector.load %arg8[%c0_68, %c0_69] : memref<32x32xbf16, #tpu.memory_space<vmem>>, vector<32x32xbf16>
      %cst_70 = arith.constant dense<0.000000e+00> : vector<8x32xf32>
      %129 = tpu.matmul %122, %128, %cst_70 {dimension_numbers = #tpu.dot_dimension_numbers<[1], [0], [0], [1], [0, 0, 1, 1], [], []>} : vector<8x32xbf16>, vector<32x32xbf16>, vector<8x32xf32> -> vector<8x32xf32>
      %c0_71 = arith.constant 0 : index
      %c0_72 = arith.constant 0 : index
      %130 = vector.load %arg9[%c0_71, %c0_72] : memref<1x32xf32, #tpu.memory_space<vmem>>, vector<1x32xf32>
      %131 = vector.broadcast %130 : vector<1x32xf32> to vector<8x32xf32>
      %132 = arith.addf %129, %131 : vector<8x32xf32>
      %133 = vector.shape_cast %127 : vector<8x32xf32> to vector<8x4x8xf32>
      %134 = tpu.transpose %133, [1, 0, 2] : vector<8x4x8xf32> -> vector<4x8x8xf32>
      %135 = arith.truncf %134 : vector<4x8x8xf32> to vector<4x8x8xbf16>
      %c0_73 = arith.constant 0 : index
      %c0_74 = arith.constant 0 : index
      %c0_75 = arith.constant 0 : index
      %136 = vector.load %arg21[%c0_73, %c0_74, %c0_75] : memref<4x8x8xbf16, #tpu.memory_space<vmem>>, vector<4x8x8xbf16>
      tpu.vector_store %arg21[%c0_73, %c0_74, %c0_75], %135 {strides = array<i32>} : memref<4x8x8xbf16, #tpu.memory_space<vmem>>, vector<4x8x8xbf16>,
      %137 = vector.shape_cast %132 : vector<8x32xf32> to vector<8x4x8xf32>
      %138 = tpu.transpose %137, [1, 0, 2] : vector<8x4x8xf32> -> vector<4x8x8xf32>
      %139 = arith.truncf %138 : vector<4x8x8xf32> to vector<4x8x8xbf16>
      %c0_76 = arith.constant 0 : index
      %c0_77 = arith.constant 0 : index
      %c0_78 = arith.constant 0 : index
      %140 = vector.load %arg22[%c0_76, %c0_77, %c0_78] : memref<4x8x8xbf16, #tpu.memory_space<vmem>>, vector<4x8x8xbf16>
      tpu.vector_store %arg22[%c0_76, %c0_77, %c0_78], %139 {strides = array<i32>} : memref<4x8x8xbf16, #tpu.memory_space<vmem>>, vector<4x8x8xbf16>,
    } else {
    }
    %c8_i32 = arith.constant 8 : i32
    %3 = arith.muli %arg1, %c8_i32 : i32
    %4 = tpu.assume_multiple %3, 8 : i32
    %c0 = arith.constant 0 : index
    %5 = arith.index_cast %4 : i32 to index
    %c0_1 = arith.constant 0 : index
    %6 = vector.load %arg2[%c0, %5, %c0_1] : memref<1x8x32xf32, #tpu.memory_space<vmem>>, vector<1x8x32xf32>
    %7 = vector.shape_cast %6 : vector<1x8x32xf32> to vector<8x32xf32>
    %c0_2 = arith.constant 0 : index
    %c0_3 = arith.constant 0 : index
    %c0_4 = arith.constant 0 : index
    %8 = vector.load %arg3[%c0_2, %c0_3, %c0_4] : memref<1x1x8xf32, #tpu.memory_space<vmem>>, vector<1x1x8xf32>
    %9 = vector.shape_cast %8 : vector<1x1x8xf32> to vector<1x8xf32>
    %10 = arith.truncf %7 : vector<8x32xf32> to vector<8x32xbf16>
    %c0_5 = arith.constant 0 : index
    %c0_6 = arith.constant 0 : index
    %11 = vector.load %arg4[%c0_5, %c0_6] : memref<32x32xbf16, #tpu.memory_space<vmem>>, vector<32x32xbf16>
    %cst = arith.constant dense<0.000000e+00> : vector<8x32xf32>
    %12 = tpu.matmul %10, %11, %cst {dimension_numbers = #tpu.dot_dimension_numbers<[1], [0], [0], [1], [0, 0, 1, 1], [], []>} : vector<8x32xbf16>, vector<32x32xbf16>, vector<8x32xf32> -> vector<8x32xf32>
    %c0_7 = arith.constant 0 : index
    %c0_8 = arith.constant 0 : index
    %13 = vector.load %arg5[%c0_7, %c0_8] : memref<1x32xf32, #tpu.memory_space<vmem>>, vector<1x32xf32>
    %14 = vector.broadcast %13 : vector<1x32xf32> to vector<8x32xf32>
    %15 = arith.addf %12, %14 : vector<8x32xf32>
    %16 = vector.shape_cast %15 : vector<8x32xf32> to vector<8x4x8xf32>
    %17 = tpu.transpose %16, [1, 0, 2] : vector<8x4x8xf32> -> vector<4x8x8xf32>
    %18 = arith.truncf %17 : vector<4x8x8xf32> to vector<4x8x8xbf16>
    %c0_9 = arith.constant 0 : index
    %c0_10 = arith.constant 0 : index
    %c0_11 = arith.constant 0 : index
    %19 = vector.load %arg21[%c0_9, %c0_10, %c0_11] : memref<4x8x8xbf16, #tpu.memory_space<vmem>>, vector<4x8x8xbf16>
    "tpu.trace_start"() <{level = 10 : i32, message = "hqd,hkd->hqk"}> : () -> ()
    %cst_12 = arith.constant dense<0.000000e+00> : vector<4x8x8xf32>
    %20 = tpu.matmul %18, %19, %cst_12 {dimension_numbers = #tpu.dot_dimension_numbers<[2], [2], [1], [1], [0, 0, 0, 1, 1, 1], [0], [0]>} : vector<4x8x8xbf16>, vector<4x8x8xbf16>, vector<4x8x8xf32> -> vector<4x8x8xf32>
    "tpu.trace_stop"() : () -> ()
    %cst_13 = arith.constant 1.000000e+00 : f32
    %21 = vector.broadcast %cst_13 : f32 to vector<1x8xf32>
    %22 = arith.subf %9, %21 : vector<1x8xf32>
    %cst_14 = arith.constant 1.000000e+30 : f32
    %23 = vector.broadcast %cst_14 : f32 to vector<1x8xf32>
    %24 = arith.mulf %22, %23 : vector<1x8xf32>
    %25 = vector.shape_cast %24 : vector<1x8xf32> to vector<1x1x8xf32>
    %26 = vector.broadcast %25 : vector<1x1x8xf32> to vector<4x8x8xf32>
    %27 = arith.addf %20, %26 : vector<4x8x8xf32>
    %cst_15 = arith.constant dense<0xFF800000> : vector<4x8xf32>
    %28 = vector.multi_reduction <maximumf>, %27, %cst_15 [2] : vector<4x8x8xf32> to vector<4x8xf32>
    %29 = vector.shape_cast %28 : vector<4x8xf32> to vector<4x8x1xf32>
    %30 = vector.broadcast %29 : vector<4x8x1xf32> to vector<4x8x8xf32>
    %31 = arith.subf %27, %30 : vector<4x8x8xf32>
    %32 = math.exp %31 : vector<4x8x8xf32>
    %cst_16 = arith.constant dense<0.000000e+00> : vector<4x8xf32>
    %33 = vector.multi_reduction <add>, %32, %cst_16 [2] : vector<4x8x8xf32> to vector<4x8xf32>
    %34 = vector.shape_cast %33 : vector<4x8xf32> to vector<4x8x1xf32>
    %35 = arith.truncf %32 : vector<4x8x8xf32> to vector<4x8x8xbf16>
    %c0_17 = arith.constant 0 : index
    %c0_18 = arith.constant 0 : index
    %c0_19 = arith.constant 0 : index
    %36 = vector.load %arg22[%c0_17, %c0_18, %c0_19] : memref<4x8x8xbf16, #tpu.memory_space<vmem>>, vector<4x8x8xbf16>
    "tpu.trace_start"() <{level = 10 : i32, message = "hqk,hkd->hqd"}> : () -> ()
    %cst_20 = arith.constant dense<0.000000e+00> : vector<4x8x8xf32>
    %37 = tpu.matmul %35, %36, %cst_20 {dimension_numbers = #tpu.dot_dimension_numbers<[2], [1], [1], [2], [0, 0, 0, 1, 1, 2], [0], [0]>} : vector<4x8x8xbf16>, vector<4x8x8xbf16>, vector<4x8x8xf32> -> vector<4x8x8xf32>
    "tpu.trace_stop"() : () -> ()
    %38 = tpu.reciprocal %34 {approx = true} : vector<4x8x1xf32> -> vector<4x8x1xf32>
    %39 = vector.broadcast %38 : vector<4x8x1xf32> to vector<4x8x8xf32>
    %40 = arith.mulf %37, %39 : vector<4x8x8xf32>
    %41 = tpu.transpose %40, [1, 0, 2] : vector<4x8x8xf32> -> vector<8x4x8xf32>
    %42 = vector.shape_cast %41 : vector<8x4x8xf32> to vector<8x32xf32>
    %43 = arith.truncf %42 : vector<8x32xf32> to vector<8x32xbf16>
    %c0_21 = arith.constant 0 : index
    %c0_22 = arith.constant 0 : index
    %44 = vector.load %arg10[%c0_21, %c0_22] : memref<32x32xbf16, #tpu.memory_space<vmem>>, vector<32x32xbf16>
    %cst_23 = arith.constant dense<0.000000e+00> : vector<8x32xf32>
    %45 = tpu.matmul %43, %44, %cst_23 {dimension_numbers = #tpu.dot_dimension_numbers<[1], [0], [0], [1], [0, 0, 1, 1], [], []>} : vector<8x32xbf16>, vector<32x32xbf16>, vector<8x32xf32> -> vector<8x32xf32>
    %c0_24 = arith.constant 0 : index
    %c0_25 = arith.constant 0 : index
    %46 = vector.load %arg11[%c0_24, %c0_25] : memref<1x32xf32, #tpu.memory_space<vmem>>, vector<1x32xf32>
    %47 = vector.broadcast %46 : vector<1x32xf32> to vector<8x32xf32>
    %48 = arith.addf %45, %47 : vector<8x32xf32>
    %cst_26 = arith.constant 1.000000e+00 : f32
    %49 = vector.broadcast %cst_26 : f32 to vector<8x32xf32>
    %50 = arith.mulf %49, %7 : vector<8x32xf32>
    %51 = arith.addf %48, %50 : vector<8x32xf32>
    %c0_27 = arith.constant 0 : index
    %c0_28 = arith.constant 0 : index
    %52 = vector.load %arg12[%c0_27, %c0_28] : memref<1x32xf32, #tpu.memory_space<vmem>>, vector<1x32xf32>
    %c0_29 = arith.constant 0 : index
    %c0_30 = arith.constant 0 : index
    %53 = vector.load %arg13[%c0_29, %c0_30] : memref<1x32xf32, #tpu.memory_space<vmem>>, vector<1x32xf32>
    %cst_31 = arith.constant dense<0.000000e+00> : vector<8xf32>
    %54 = vector.multi_reduction <add>, %51, %cst_31 [1] : vector<8x32xf32> to vector<8xf32>
    %55 = vector.shape_cast %54 : vector<8xf32> to vector<8x1xf32>
    %cst_32 = arith.constant 3.200000e+01 : f32
    %56 = vector.broadcast %cst_32 : f32 to vector<8x1xf32>
    %57 = arith.divf %55, %56 : vector<8x1xf32>
    %58 = vector.broadcast %57 : vector<8x1xf32> to vector<8x32xf32>
    %59 = arith.subf %51, %58 : vector<8x32xf32>
    %60 = arith.mulf %59, %59 : vector<8x32xf32>
    %cst_33 = arith.constant dense<0.000000e+00> : vector<8xf32>
    %61 = vector.multi_reduction <add>, %60, %cst_33 [1] : vector<8x32xf32> to vector<8xf32>
    %62 = vector.shape_cast %61 : vector<8xf32> to vector<8x1xf32>
    %cst_34 = arith.constant 3.200000e+01 : f32
    %63 = vector.broadcast %cst_34 : f32 to vector<8x1xf32>
    %64 = arith.divf %62, %63 : vector<8x1xf32>
    %65 = vector.broadcast %57 : vector<8x1xf32> to vector<8x32xf32>
    %66 = arith.subf %51, %65 : vector<8x32xf32>
    %cst_35 = arith.constant 9.99999997E-7 : f32
    %67 = vector.broadcast %cst_35 : f32 to vector<8x1xf32>
    %68 = arith.addf %64, %67 : vector<8x1xf32>
    %69 = math.rsqrt %68 : vector<8x1xf32>
    %70 = vector.broadcast %69 : vector<8x1xf32> to vector<8x32xf32>
    %71 = arith.mulf %66, %70 : vector<8x32xf32>
    %72 = vector.broadcast %52 : vector<1x32xf32> to vector<8x32xf32>
    %73 = arith.mulf %71, %72 : vector<8x32xf32>
    %74 = vector.broadcast %53 : vector<1x32xf32> to vector<8x32xf32>
    %75 = arith.addf %73, %74 : vector<8x32xf32>
    %76 = arith.truncf %75 : vector<8x32xf32> to vector<8x32xbf16>
    %c0_36 = arith.constant 0 : index
    %c0_37 = arith.constant 0 : index
    %77 = vector.load %arg14[%c0_36, %c0_37] : memref<32x64xbf16, #tpu.memory_space<vmem>>, vector<32x64xbf16>
    %cst_38 = arith.constant dense<0.000000e+00> : vector<8x64xf32>
    %78 = tpu.matmul %76, %77, %cst_38 {dimension_numbers = #tpu.dot_dimension_numbers<[1], [0], [0], [1], [0, 0, 1, 1], [], []>} : vector<8x32xbf16>, vector<32x64xbf16>, vector<8x64xf32> -> vector<8x64xf32>
    %c0_39 = arith.constant 0 : index
    %c0_40 = arith.constant 0 : index
    %79 = vector.load %arg15[%c0_39, %c0_40] : memref<1x64xf32, #tpu.memory_space<vmem>>, vector<1x64xf32>
    %80 = vector.broadcast %79 : vector<1x64xf32> to vector<8x64xf32>
    %81 = arith.addf %78, %80 : vector<8x64xf32>
    %cst_41 = arith.constant 0.000000e+00 : f32
    %82 = vector.broadcast %cst_41 : f32 to vector<8x64xf32>
    %83 = arith.maximumf %81, %82 : vector<8x64xf32>
    %84 = arith.truncf %83 : vector<8x64xf32> to vector<8x64xbf16>
    %c0_42 = arith.constant 0 : index
    %c0_43 = arith.constant 0 : index
    %85 = vector.load %arg16[%c0_42, %c0_43] : memref<64x32xbf16, #tpu.memory_space<vmem>>, vector<64x32xbf16>
    %cst_44 = arith.constant dense<0.000000e+00> : vector<8x32xf32>
    %86 = tpu.matmul %84, %85, %cst_44 {dimension_numbers = #tpu.dot_dimension_numbers<[1], [0], [0], [1], [0, 0, 1, 1], [], []>} : vector<8x64xbf16>, vector<64x32xbf16>, vector<8x32xf32> -> vector<8x32xf32>
    %c0_45 = arith.constant 0 : index
    %c0_46 = arith.constant 0 : index
    %87 = vector.load %arg17[%c0_45, %c0_46] : memref<1x32xf32, #tpu.memory_space<vmem>>, vector<1x32xf32>
    %88 = vector.broadcast %87 : vector<1x32xf32> to vector<8x32xf32>
    %89 = arith.addf %86, %88 : vector<8x32xf32>
    %cst_47 = arith.constant 1.000000e+00 : f32
    %90 = vector.broadcast %cst_47 : f32 to vector<8x32xf32>
    %91 = arith.mulf %90, %75 : vector<8x32xf32>
    %92 = arith.addf %89, %91 : vector<8x32xf32>
    %c0_48 = arith.constant 0 : index
    %c0_49 = arith.constant 0 : index
    %93 = vector.load %arg18[%c0_48, %c0_49] : memref<1x32xf32, #tpu.memory_space<vmem>>, vector<1x32xf32>
    %c0_50 = arith.constant 0 : index
    %c0_51 = arith.constant 0 : index
    %94 = vector.load %arg19[%c0_50, %c0_51] : memref<1x32xf32, #tpu.memory_space<vmem>>, vector<1x32xf32>
    %cst_52 = arith.constant dense<0.000000e+00> : vector<8xf32>
    %95 = vector.multi_reduction <add>, %92, %cst_52 [1] : vector<8x32xf32> to vector<8xf32>
    %96 = vector.shape_cast %95 : vector<8xf32> to vector<8x1xf32>
    %cst_53 = arith.constant 3.200000e+01 : f32
    %97 = vector.broadcast %cst_53 : f32 to vector<8x1xf32>
    %98 = arith.divf %96, %97 : vector<8x1xf32>
    %99 = vector.broadcast %98 : vector<8x1xf32> to vector<8x32xf32>
    %100 = arith.subf %92, %99 : vector<8x32xf32>
    %101 = arith.mulf %100, %100 : vector<8x32xf32>
    %cst_54 = arith.constant dense<0.000000e+00> : vector<8xf32>
    %102 = vector.multi_reduction <add>, %101, %cst_54 [1] : vector<8x32xf32> to vector<8xf32>
    %103 = vector.shape_cast %102 : vector<8xf32> to vector<8x1xf32>
    %cst_55 = arith.constant 3.200000e+01 : f32
    %104 = vector.broadcast %cst_55 : f32 to vector<8x1xf32>
    %105 = arith.divf %103, %104 : vector<8x1xf32>
    %106 = vector.broadcast %98 : vector<8x1xf32> to vector<8x32xf32>
    %107 = arith.subf %92, %106 : vector<8x32xf32>
    %cst_56 = arith.constant 9.99999997E-7 : f32
    %108 = vector.broadcast %cst_56 : f32 to vector<8x1xf32>
    %109 = arith.addf %105, %108 : vector<8x1xf32>
    %110 = math.rsqrt %109 : vector<8x1xf32>
    %111 = vector.broadcast %110 : vector<8x1xf32> to vector<8x32xf32>
    %112 = arith.mulf %107, %111 : vector<8x32xf32>
    %113 = vector.broadcast %93 : vector<1x32xf32> to vector<8x32xf32>
    %114 = arith.mulf %112, %113 : vector<8x32xf32>
    %115 = vector.broadcast %94 : vector<1x32xf32> to vector<8x32xf32>
    %116 = arith.addf %114, %115 : vector<8x32xf32>
    %c0_57 = arith.constant 0 : index
    %c0_58 = arith.constant 0 : index
    %c0_59 = arith.constant 0 : index
    %117 = vector.load %arg20[%c0_57, %c0_58, %c0_59] : memref<1x8x32xf32, #tpu.memory_space<vmem>>, vector<1x8x32xf32>
    %118 = vector.shape_cast %117 : vector<1x8x32xf32> to vector<8x32xf32>
    %119 = vector.shape_cast %116 : vector<8x32xf32> to vector<1x8x32xf32>
    tpu.vector_store %arg20[%c0_57, %c0_58, %c0_59], %119 {strides = array<i32>} : memref<1x8x32xf32, #tpu.memory_space<vmem>>, vector<1x8x32xf32>,
    return
  }
  func.func @transform_0(%arg0: i32, %arg1: i32) -> (i32, i32, i32) {
    %c0_i32 = arith.constant 0 : i32
    %c0_i32_0 = arith.constant 0 : i32
    %c0_i32_1 = arith.constant 0 : i32
    return %arg0, %c0_i32, %c0_i32_0 : i32, i32, i32
  }
  func.func @transform_1(%arg0: i32, %arg1: i32) -> (i32, i32, i32) {
    %c0_i32 = arith.constant 0 : i32
    %c0_i32_0 = arith.constant 0 : i32
    %c0_i32_1 = arith.constant 0 : i32
    return %arg0, %c0_i32, %c0_i32_0 : i32, i32, i32
  }
  func.func @transform_2(%arg0: i32, %arg1: i32) -> (i32, i32) {
    %c0_i32 = arith.constant 0 : i32
    %c0_i32_0 = arith.constant 0 : i32
    %c0_i32_1 = arith.constant 0 : i32
    return %c0_i32, %c0_i32_0 : i32, i32
  }
  func.func @transform_3(%arg0: i32, %arg1: i32) -> (i32, i32) {
    %c0_i32 = arith.constant 0 : i32
    %c0_i32_0 = arith.constant 0 : i32
    %c0_i32_1 = arith.constant 0 : i32
    return %c0_i32, %c0_i32_0 : i32, i32
  }
  func.func @transform_4(%arg0: i32, %arg1: i32) -> (i32, i32) {
    %c0_i32 = arith.constant 0 : i32
    %c0_i32_0 = arith.constant 0 : i32
    %c0_i32_1 = arith.constant 0 : i32
    return %c0_i32, %c0_i32_0 : i32, i32
  }
  func.func @transform_5(%arg0: i32, %arg1: i32) -> (i32, i32) {
    %c0_i32 = arith.constant 0 : i32
    %c0_i32_0 = arith.constant 0 : i32
    %c0_i32_1 = arith.constant 0 : i32
    return %c0_i32, %c0_i32_0 : i32, i32
  }
  func.func @transform_6(%arg0: i32, %arg1: i32) -> (i32, i32) {
    %c0_i32 = arith.constant 0 : i32
    %c0_i32_0 = arith.constant 0 : i32
    %c0_i32_1 = arith.constant 0 : i32
    return %c0_i32, %c0_i32_0 : i32, i32
  }
  func.func @transform_7(%arg0: i32, %arg1: i32) -> (i32, i32) {
    %c0_i32 = arith.constant 0 : i32
    %c0_i32_0 = arith.constant 0 : i32
    %c0_i32_1 = arith.constant 0 : i32
    return %c0_i32, %c0_i32_0 : i32, i32
  }
  func.func @transform_8(%arg0: i32, %arg1: i32) -> (i32, i32) {
    %c0_i32 = arith.constant 0 : i32
    %c0_i32_0 = arith.constant 0 : i32
    %c0_i32_1 = arith.constant 0 : i32
    return %c0_i32, %c0_i32_0 : i32, i32
  }
  func.func @transform_9(%arg0: i32, %arg1: i32) -> (i32, i32) {
    %c0_i32 = arith.constant 0 : i32
    %c0_i32_0 = arith.constant 0 : i32
    %c0_i32_1 = arith.constant 0 : i32
    return %c0_i32, %c0_i32_0 : i32, i32
  }
  func.func @transform_10(%arg0: i32, %arg1: i32) -> (i32, i32) {
    %c0_i32 = arith.constant 0 : i32
    %c0_i32_0 = arith.constant 0 : i32
    %c0_i32_1 = arith.constant 0 : i32
    return %c0_i32, %c0_i32_0 : i32, i32
  }
  func.func @transform_11(%arg0: i32, %arg1: i32) -> (i32, i32) {
    %c0_i32 = arith.constant 0 : i32
    %c0_i32_0 = arith.constant 0 : i32
    %c0_i32_1 = arith.constant 0 : i32
    return %c0_i32, %c0_i32_0 : i32, i32
  }
  func.func @transform_12(%arg0: i32, %arg1: i32) -> (i32, i32) {
    %c0_i32 = arith.constant 0 : i32
    %c0_i32_0 = arith.constant 0 : i32
    %c0_i32_1 = arith.constant 0 : i32
    return %c0_i32, %c0_i32_0 : i32, i32
  }
  func.func @transform_13(%arg0: i32, %arg1: i32) -> (i32, i32) {
    %c0_i32 = arith.constant 0 : i32
    %c0_i32_0 = arith.constant 0 : i32
    %c0_i32_1 = arith.constant 0 : i32
    return %c0_i32, %c0_i32_0 : i32, i32
  }
  func.func @transform_14(%arg0: i32, %arg1: i32) -> (i32, i32) {
    %c0_i32 = arith.constant 0 : i32
    %c0_i32_0 = arith.constant 0 : i32
    %c0_i32_1 = arith.constant 0 : i32
    return %c0_i32, %c0_i32_0 : i32, i32
  }
  func.func @transform_15(%arg0: i32, %arg1: i32) -> (i32, i32) {
    %c0_i32 = arith.constant 0 : i32
    %c0_i32_0 = arith.constant 0 : i32
    %c0_i32_1 = arith.constant 0 : i32
    return %c0_i32, %c0_i32_0 : i32, i32
  }
  func.func @transform_16(%arg0: i32, %arg1: i32) -> (i32, i32) {
    %c0_i32 = arith.constant 0 : i32
    %c0_i32_0 = arith.constant 0 : i32
    %c0_i32_1 = arith.constant 0 : i32
    return %c0_i32, %c0_i32_0 : i32, i32
  }
  func.func @transform_17(%arg0: i32, %arg1: i32) -> (i32, i32) {
    %c0_i32 = arith.constant 0 : i32
    %c0_i32_0 = arith.constant 0 : i32
    %c0_i32_1 = arith.constant 0 : i32
    return %c0_i32, %c0_i32_0 : i32, i32
  }
  func.func @transform_18(%arg0: i32, %arg1: i32) -> (i32, i32, i32) {
    %c0_i32 = arith.constant 0 : i32
    %c0_i32_0 = arith.constant 0 : i32
    return %arg0, %arg1, %c0_i32 : i32, i32, i32
  }
}

</mosaic_0001>

<bundles_post_ra>
// kernel: tpu_custom_call.1
= control target key start
LH: loop header
LB: loop body
LE: loop exit
PB: predicated region body
PF: predicated region fallthrough
CT: control target
= control target key end

     0   :  { %s4670_s0 = inlined_call_operand.hbm [shape: f32[2,8,32], index: 0, kind: input, shape index: {}]   ;;  %s4671_s1 = inlined_call_operand.hbm [shape: f32[2,1,8], index: 1, kind: input, shape index: {}]   ;;  %s4672_s2 = inlined_call_operand.hbm [shape: bf16[32,32], index: 2, kind: input, shape index: {}]   ;;  %s4673_s3 = inlined_call_operand.hbm [shape: f32[1,32], index: 3, kind: input, shape index: {}]   ;;  %s4674_s4 = inlined_call_operand.hbm [shape: bf16[32,32], index: 4, kind: input, shape index: {}]   ;;  %s4675_s5 = inlined_call_operand.hbm [shape: f32[1,32], index: 5, kind: input, shape index: {}]   ;;  %s4676_s6 = inlined_call_operand.hbm [shape: bf16[32,32], index: 6, kind: input, shape index: {}]   ;;  %s4677_s7 = inlined_call_operand.hbm [shape: f32[1,32], index: 7, kind: input, shape index: {}]   ;;  %s4678_s8 = inlined_call_operand.hbm [shape: bf16[32,32], index: 8, kind: input, shape index: {}]   ;;  %s4679_s9 = inlined_call_operand.hbm [shape: f32[1,32], index: 9, kind: input, shape index: {}]   ;;  %s4680_s10 = inlined_call_operand.hbm [shape: f32[1,32], index: 10, kind: input, shape index: {}]   ;;  %s4681_s11 = inlined_call_operand.hbm [shape: f32[1,32], index: 11, kind: input, shape index: {}]   ;;  %s4682_s12 = inlined_call_operand.hbm [shape: bf16[32,64], index: 12, kind: input, shape index: {}]   ;;  %s4683_s13 = inlined_call_operand.hbm [shape: f32[1,64], index: 13, kind: input, shape index: {}]   ;;  %s4684_s14 = inlined_call_operand.hbm [shape: bf16[64,32], index: 14, kind: input, shape index: {}]   ;;  %s4685_s15 = inlined_call_operand.hbm [shape: f32[1,32], index: 15, kind: input, shape index: {}]   ;;  %s4686_s16 = inlined_call_operand.hbm [shape: f32[1,32], index: 16, kind: input, shape index: {}]   ;;  %s4687_s17 = inlined_call_operand.hbm [shape: f32[1,32], index: 17, kind: input, shape index: {}]   ;;  %s4688_s18 = inlined_call_operand.hbm [shape: f32[2,8,32], index: 18, kind: output, shape index: {}]  }
   0x1   :  { %4713 = sst [smem:[#allocation55_spill]] %s4670_s0 }
   0x2   :  { %4714 = sst [smem:[#allocation56_spill]] %s4671_s1 }
   0x3   :  { %4715 = sst [smem:[#allocation57_spill]] %s4672_s2 }
   0x4   :  { %4716 = sst [smem:[#allocation58_spill]] %s4673_s3 }
   0x5   :  { %4717 = sst [smem:[#allocation59_spill]] %s4675_s5 }
   0x6   :  { %4718 = sst [smem:[#allocation60_spill]] %s4677_s7 }
   0x7   :  { %4719 = sst [smem:[#allocation61_spill]] %s4679_s9 }
   0x8   :  { %4720 = sst [smem:[#allocation62_spill]] %s4681_s11 }
   0x9   :  { %4721 = sst [smem:[#allocation63_spill]] %s4688_s18 }
   0xa   :  { %23 = vsyncpa [#allocation5], 0 }
   0xb   :  { %25 = vsyncpa [#allocation5 + $0x1], 0 }
   0xc   :  { %26 = vsyncpa [#allocation8], 0 }
   0xd   :  { %27 = vsyncpa [#allocation11], 0 }
   0xe   :  { %28 = vsyncpa [#allocation14], 0 }
   0xf   :  { %29 = vsyncpa [#allocation17], 0 }
  0x10   :  { %30 = vsyncpa [#allocation20], 0 }
  0x11   :  { %31 = vsyncpa [#allocation23], 0 }
  0x12   :  { %32 = vsyncpa [#allocation26], 0 }
  0x13   :  { %33 = vsyncpa [#allocation29], 0 }
  0x14   :  { %34 = vsyncpa [#allocation32], 0 }
  0x15   :  { %35 = vsyncpa [#allocation6], 0 }
  0x16   :  { %37 = vsyncpa [#allocation6 + $0x1], 0  ;;  %s3895_s27 = smov 0   ;;  %s3897_s28 = smov 0  }
  0x17   :  { %s3899_s29 = smov 0   ;;  %s3901_s30 = smov 0  }
  0x18   :  { %s3903_s0 = smov 0   ;;  %s3905_s19 = smov 0  }
  0x19 LB: > { %4722 = sst [smem:[#allocation46_spill]] %s3747_s27  ;;  %s2633_s1 = sadd.s32 4294967295, %s3767_s19   ;;  %s3767_s19 = sphi %s3905_s19, %s43_s19   ;;  %s3763_s0 = sphi %s3903_s0, %s4772_s0   ;;  %s3759_s30 = sphi %s3901_s30, %s4771_s30   ;;  %s3755_s29 = sphi %s3899_s29, %s4770_s29   ;;  %s3751_s28 = sphi %s3897_s28, %s4769_s28   ;;  %s3747_s27 = sphi %s3895_s27, %s4768_s27  }
  0x1a   : > { %4723 = sst [smem:[#allocation47_spill]] %s3751_s28  ;;  %s2634_s20 = sadd.s32 4294967294, %s3767_s19  }
  0x1b   : > { %4724 = sst [smem:[#allocation48_spill]] %s3759_s30  ;;  %p75_p0 = scmp.ne.s32.totalorder %s3751_s28, %s3747_s27 }
  0x1c   : > { %4725 = sst [smem:[#allocation49_spill]] %s3767_s19  ;;  %p3929_p1 = scmp.eq.s32.totalorder %s2633_s1, 0 }
  0x1d   : > { %p3933_p2 = scmp.eq.s32.totalorder %s2633_s1, 1  ;;  %p469_p3 = scmp.eq.s32.totalorder %s2634_s20, 1 }
  0x1e   : > { %s4726_s21 = scalar_select %p3929_p1, 1, 0 }
  0x1f   : > { %s4728_s22 = scalar_select %p3933_p2, 1, 0 }
  0x20   : > { %4727 = sst [smem:[#allocation50_spill]] %s4726_s21  ;;  %p3939_p4 = por %p3929_p1, %p75_p0 }
  0x21   : > { %4729 = sst [smem:[#allocation51_spill]] %s4728_s22  ;;  %p2635_p5 = scmp.ge.s32.totalorder %s3767_s19, 1 }
  0x22   : > { %s4730_s2 = scalar_select %p3939_p4, 1, 0 }
  0x23   : > { %p3944_p6 = por %p469_p3, %p75_p0  ;;  %p476_p7 = scmp.lt.s32.totalorder %s3767_s19, 3 }
  0x24   : > { %4731 = sst [smem:[#allocation52_spill]] %s4730_s2  ;;  %s2636_s24 = sshll.u32 %s3759_s30, 4 }
  0x25   : > { %s4732_s23 = scalar_select %p3944_p6, 1, 0 }
  0x26   : > { %p3950_p8 = pnand %p2635_p5, %p476_p7  ;;  %s4736_s20 = sld [smem:[#allocation56_spill]] }
  0x27   : > { %4733 = sst [smem:[#allocation53_spill]] %s4732_s23  ;;  %s3769_s18 = smov [#allocation7]  }
  0x28   : > { %s4734_s25 = scalar_select %p3950_p8, 1, 0 }
  0x29   : > { %s491_s22 = sshll.u32 %s3769_s18, 4  ;;  %p2932_p9 = pneg %p3950_p8  ;;  %s3961_s22 = int_to_ptr.vmem [resolvable:$true] %s491_s22 }
  0x2a   : > { %4735 = sst [smem:[#allocation54_spill]] %s4734_s25  ;;  %s3770_s26 = smov [#allocation10]  }
  0x2b   : > { %p3966_p11 = pnand %p2932_p9, %p3939_p4  ;;  %p3972_p12 = pnand %p2932_p9, %p3929_p1 }
  0x2c   : > { %s3957_s27 = scalar_lea.hbm %s4736_s20, %s2636_s24  ;;  %s515_s18 = sshll.u32 %s3770_s26, 4  ;;  %s516_s18 = int_to_ptr.vmem [resolvable:$true] %s515_s18 }
  0x2d   : > { %s4738_s24 = scalar_select %p3972_p12, 1, 0 }
  0x2e   : > { %s3137_s1 = scalar_lea.hbm %s3957_s27, 16  ;;  %p3139_p0 = pneg %p3966_p11 }
  0x2f   : > { %p3138_p13 = scmp.ne.s32.totalorder %s3957_s27, %s3137_s1  ;;  %s3142_s21 = scalar_lea.hbm %s4736_s20, 32 }
  0x30   : > { %p3143_p7 = scmp.lt.u32.totalorder %s3957_s27, %s4736_s20  ;;  %p3144_p9 = scmp.lt.u32.totalorder %s3142_s21, %s3137_s1 }
  0x31   : > { %p3140_p3 = pnand %p3139_p0, %p3138_p13  ;;  %p3146_p6 = scmp.lt.u32.totalorder %s3137_s1, %s3957_s27 }
  0x32   : > { %p3145_p10 = por %p3144_p9, %p3143_p7 }
  0x33   : > { %p3141_p5 = pneg %p3140_p3 }
  0x34   : > { %p3147_p1 = por %p3146_p6, %p3145_p10 }
  0x36   : > { %p3148_p4 = pnand %p3147_p1, %p3141_p5 }
  0x38   : > { %3151 = shalt.err (!%p3148_p4)
}
  0x39   : > { %s3152_s26 = scalar_lea.vmem %s3961_s22, 16  ;;  %s3159_s30 = scalar_lea.vmem %s3961_s22, 32 }
  0x3a   : > { %p3153_p13 = scmp.ne.s32.totalorder %s3961_s22, %s3152_s26  ;;  %p3160_p2 = scmp.lt.s32.totalorder %s3961_s22, %s3961_s22 }
  0x3b   : > { %p3161_p12 = scmp.lt.s32.totalorder %s3159_s30, %s3152_s26 }
  0x3c   : > { %p3155_p3 = pnand %p3153_p13, %p3139_p0 }
  0x3d   : > { %p3162_p7 = por %p3161_p12, %p3160_p2 }
  0x3e   : > { %p3156_p8 = pneg %p3155_p3 }
  0x40   : > { %p3163_p9 = pnand %p3162_p7, %p3156_p8 }
  0x42   : > { %3166 = shalt.err (!%p3163_p9)
}
  0x43   : > { %2935 = dma.hbm_to_vmem [thread:$0]  (!%p3966_p11), %s3957_s27, 16, %s3961_s22, [#allocation8]  }
  0x44   : > { %s3771_s19 = smov [#allocation13]   ;;  %s4739_s3 = sld [smem:[#allocation58_spill]] }
  0x45   : > { %s539_s21 = sshll.u32 %s3771_s19, 4  ;;  %p4740_p2 = scmp.ne.s32.totalorder %s4738_s24, 0  ;;  %s540_s21 = int_to_ptr.vmem [resolvable:$true] %s539_s21 }
  0x47   : > { %p4011_p4 = pneg %p4740_p2 }
  0x4a   : > { %s3167_s1 = scalar_lea.hbm %s4739_s3, 16 }
  0x4b   : > { %p3168_p1 = scmp.ne.s32.totalorder %s4739_s3, %s3167_s1  ;;  %p3174_p10 = scmp.lt.u32.totalorder %s3167_s1, %s4739_s3 }
  0x4d   : > { %p3170_p6 = pnand %p4011_p4, %p3168_p1 }
  0x4f   : > { %p3171_p8 = pneg %p3170_p6 }
  0x51   : > { %p3176_p11 = pnand %p3174_p10, %p3171_p8 }
  0x53   : > { %3179 = shalt.err (!%p3176_p11)
}
  0x54   : > { %s3180_s23 = scalar_lea.vmem %s516_s18, 16  ;;  %s3187_s28 = scalar_lea.vmem %s516_s18, 32 }
  0x55   : > { %p3181_p12 = scmp.ne.s32.totalorder %s516_s18, %s3180_s23  ;;  %p3188_p13 = scmp.lt.s32.totalorder %s516_s18, %s516_s18 }
  0x56   : > { %p3189_p3 = scmp.lt.s32.totalorder %s3187_s28, %s3180_s23 }
  0x57   : > { %p3183_p0 = pnand %p3181_p12, %p4011_p4 }
  0x58   : > { %p3190_p7 = por %p3189_p3, %p3188_p13 }
  0x59   : > { %p3184_p5 = pneg %p3183_p0 }
  0x5b   : > { %p3191_p9 = pnand %p3190_p7, %p3184_p5 }
  0x5d   : > { %3194 = shalt.err (!%p3191_p9)
}
  0x5e   : > { %2941 = dma.hbm_to_vmem [thread:$0]  (!%p4740_p2), %s4739_s3, 16, %s516_s18, [#allocation11]  }
  0x5f   : > { %s4742_s5 = sld [smem:[#allocation59_spill]] }
  0x65   : > { %s3195_s25 = scalar_lea.hbm %s4742_s5, 16 }
  0x66   : > { %p3196_p1 = scmp.ne.s32.totalorder %s4742_s5, %s3195_s25  ;;  %p3202_p10 = scmp.lt.u32.totalorder %s3195_s25, %s4742_s5 }
  0x68   : > { %p3198_p6 = pnand %p3196_p1, %p4011_p4 }
  0x6a   : > { %p3199_p8 = pneg %p3198_p6 }
  0x6c   : > { %p3204_p11 = pnand %p3202_p10, %p3199_p8 }
  0x6e   : > { %3207 = shalt.err (!%p3204_p11)
}
  0x6f   : > { %s3208_s28 = scalar_lea.vmem %s540_s21, 16  ;;  %s3215_s18 = scalar_lea.vmem %s540_s21, 32 }
  0x70   : > { %p3209_p12 = scmp.ne.s32.totalorder %s540_s21, %s3208_s28  ;;  %p3216_p13 = scmp.lt.s32.totalorder %s540_s21, %s540_s21 }
  0x71   : > { %p3217_p3 = scmp.lt.s32.totalorder %s3215_s18, %s3208_s28 }
  0x72   : > { %p3211_p0 = pnand %p3209_p12, %p4011_p4 }
  0x73   : > { %p3218_p7 = por %p3217_p3, %p3216_p13 }
  0x74   : > { %p3212_p5 = pneg %p3211_p0 }
  0x76   : > { %p3219_p9 = pnand %p3218_p7, %p3212_p5 }
  0x78   : > { %3222 = shalt.err (!%p3219_p9)
}
  0x79   : > { %2947 = dma.hbm_to_vmem [thread:$0]  (!%p4740_p2), %s4742_s5, 16, %s540_s21, [#allocation14]  }
  0x7a   : > { %s3772_s19 = smov [#allocation16]   ;;  %s3773_s25 = smov [#allocation19]  }
  0x7b   : > { %s563_s2 = sshll.u32 %s3772_s19, 4  ;;  %s587_s1 = sshll.u32 %s3773_s25, 4  ;;  %s564_s2 = int_to_ptr.vmem [resolvable:$true] %s563_s2  ;;  %s588_s1 = int_to_ptr.vmem [resolvable:$true] %s587_s1 }
  0x7c   : > { %s4743_s7 = sld [smem:[#allocation60_spill]] }
  0x82   : > { %s3223_s23 = scalar_lea.hbm %s4743_s7, 16 }
  0x83   : > { %p3224_p1 = scmp.ne.s32.totalorder %s4743_s7, %s3223_s23  ;;  %p3230_p10 = scmp.lt.u32.totalorder %s3223_s23, %s4743_s7 }
  0x85   : > { %p3226_p6 = pnand %p3224_p1, %p4011_p4 }
  0x87   : > { %p3227_p8 = pneg %p3226_p6 }
  0x89   : > { %p3232_p11 = pnand %p3230_p10, %p3227_p8 }
  0x8b   : > { %3235 = shalt.err (!%p3232_p11)
}
  0x8c   : > { %s3236_s21 = scalar_lea.vmem %s564_s2, 16  ;;  %s3243_s30 = scalar_lea.vmem %s564_s2, 32 }
  0x8d   : > { %p3237_p12 = scmp.ne.s32.totalorder %s564_s2, %s3236_s21  ;;  %p3244_p13 = scmp.lt.s32.totalorder %s564_s2, %s564_s2 }
  0x8e   : > { %p3245_p3 = scmp.lt.s32.totalorder %s3243_s30, %s3236_s21 }
  0x8f   : > { %p3239_p0 = pnand %p3237_p12, %p4011_p4 }
  0x90   : > { %p3246_p7 = por %p3245_p3, %p3244_p13 }
  0x91   : > { %p3240_p5 = pneg %p3239_p0 }
  0x93   : > { %p3247_p9 = pnand %p3246_p7, %p3240_p5 }
  0x95   : > { %3250 = shalt.err (!%p3247_p9)
}
  0x96   : > { %2953 = dma.hbm_to_vmem [thread:$0]  (!%p4740_p2), %s4743_s7, 16, %s564_s2, [#allocation17]  }
  0x97   : > { %s4744_s9 = sld [smem:[#allocation61_spill]] }
  0x9d   : > { %s3251_s22 = scalar_lea.hbm %s4744_s9, 16 }
  0x9e   : > { %p3252_p1 = scmp.ne.s32.totalorder %s4744_s9, %s3251_s22  ;;  %p3258_p10 = scmp.lt.u32.totalorder %s3251_s22, %s4744_s9 }
  0xa0   : > { %p3254_p6 = pnand %p3252_p1, %p4011_p4 }
  0xa2   : > { %p3255_p8 = pneg %p3254_p6 }
  0xa4   : > { %p3260_p11 = pnand %p3258_p10, %p3255_p8 }
  0xa6   : > { %3263 = shalt.err (!%p3260_p11)
}
  0xa7   : > { %s3264_s21 = scalar_lea.vmem %s588_s1, 16  ;;  %s3271_s2 = scalar_lea.vmem %s588_s1, 32 }
  0xa8   : > { %p3265_p12 = scmp.ne.s32.totalorder %s588_s1, %s3264_s21  ;;  %p3272_p13 = scmp.lt.s32.totalorder %s588_s1, %s588_s1 }
  0xa9   : > { %p3273_p3 = scmp.lt.s32.totalorder %s3271_s2, %s3264_s21 }
  0xaa   : > { %p3267_p0 = pnand %p3265_p12, %p4011_p4 }
  0xab   : > { %p3274_p7 = por %p3273_p3, %p3272_p13 }
  0xac   : > { %p3268_p5 = pneg %p3267_p0 }
  0xae   : > { %p3275_p9 = pnand %p3274_p7, %p3268_p5 }
  0xb0   : > { %3278 = shalt.err (!%p3275_p9)
}
  0xb1   : > { %2959 = dma.hbm_to_vmem [thread:$0]  (!%p4740_p2), %s4744_s9, 16, %s588_s1, [#allocation20]  }
  0xb2   : > { %s3774_s25 = smov [#allocation22]   ;;  %s3775_s27 = smov [#allocation25]  }
  0xb3   : > { %s609_s3 = sshll.u32 %s3774_s25, 4  ;;  %s633_s22 = sshll.u32 %s3775_s27, 4  ;;  %s610_s3 = int_to_ptr.vmem [resolvable:$true] %s609_s3  ;;  %s634_s22 = int_to_ptr.vmem [resolvable:$true] %s633_s22 }
  0xb4   : > { %s4745_s11 = sld [smem:[#allocation62_spill]] }
  0xba   : > { %s3279_s18 = scalar_lea.hbm %s4745_s11, 16 }
  0xbb   : > { %p3280_p1 = scmp.ne.s32.totalorder %s4745_s11, %s3279_s18  ;;  %p3286_p10 = scmp.lt.u32.totalorder %s3279_s18, %s4745_s11 }
  0xbd   : > { %p3282_p6 = pnand %p3280_p1, %p4011_p4 }
  0xbf   : > { %p3283_p8 = pneg %p3282_p6 }
  0xc1   : > { %p3288_p11 = pnand %p3286_p10, %p3283_p8 }
  0xc3   : > { %3291 = shalt.err (!%p3288_p11)
}
  0xc4   : > { %s3292_s1 = scalar_lea.vmem %s610_s3, 16  ;;  %s3299_s19 = scalar_lea.vmem %s610_s3, 32 }
  0xc5   : > { %p3293_p12 = scmp.ne.s32.totalorder %s610_s3, %s3292_s1  ;;  %p3300_p13 = scmp.lt.s32.totalorder %s610_s3, %s610_s3 }
  0xc6   : > { %p3301_p3 = scmp.lt.s32.totalorder %s3299_s19, %s3292_s1 }
  0xc7   : > { %p3295_p0 = pnand %p3293_p12, %p4011_p4 }
  0xc8   : > { %p3302_p7 = por %p3301_p3, %p3300_p13 }
  0xc9   : > { %p3296_p5 = pneg %p3295_p0 }
  0xcb   : > { %p3303_p9 = pnand %p3302_p7, %p3296_p5 }
  0xcd   : > { %3306 = shalt.err (!%p3303_p9)
}
  0xce   : > { %2965 = dma.hbm_to_vmem [thread:$0]  (!%p4740_p2), %s4745_s11, 16, %s610_s3, [#allocation23]  }
  0xcf   : > { %s3307_s18 = scalar_lea.hbm %s4683_s13, 16 }
  0xd0   : > { %p3308_p1 = scmp.ne.s32.totalorder %s4683_s13, %s3307_s18  ;;  %p3314_p10 = scmp.lt.u32.totalorder %s3307_s18, %s4683_s13 }
  0xd2   : > { %p3310_p6 = pnand %p3308_p1, %p4011_p4 }
  0xd4   : > { %p3311_p8 = pneg %p3310_p6 }
  0xd6   : > { %p3316_p11 = pnand %p3314_p10, %p3311_p8 }
  0xd8   : > { %3319 = shalt.err (!%p3316_p11)
}
  0xd9   : > { %s3320_s1 = scalar_lea.vmem %s634_s22, 16  ;;  %s3327_s3 = scalar_lea.vmem %s634_s22, 32 }
  0xda   : > { %p3321_p12 = scmp.ne.s32.totalorder %s634_s22, %s3320_s1  ;;  %p3328_p13 = scmp.lt.s32.totalorder %s634_s22, %s634_s22 }
  0xdb   : > { %p3329_p3 = scmp.lt.s32.totalorder %s3327_s3, %s3320_s1 }
  0xdc   : > { %p3323_p0 = pnand %p3321_p12, %p4011_p4 }
  0xdd   : > { %p3330_p7 = por %p3329_p3, %p3328_p13 }
  0xde   : > { %p3324_p5 = pneg %p3323_p0 }
  0xe0   : > { %p3331_p9 = pnand %p3330_p7, %p3324_p5 }
  0xe2   : > { %3334 = shalt.err (!%p3331_p9)
}
  0xe3   : > { %2971 = dma.hbm_to_vmem [thread:$0]  (!%p4740_p2), %s4683_s13, 16, %s634_s22, [#allocation26]  }
  0xe4   : > { %s3776_s27 = smov [#allocation28]   ;;  %s3777_s28 = smov [#allocation9]  }
  0xe5   : > { %s657_s23 = sshll.u32 %s3776_s27, 4  ;;  %s501_s18 = sshll.u32 %s3777_s28, 4  ;;  %s658_s23 = int_to_ptr.vmem [resolvable:$true] %s657_s23  ;;  %s502_s18 = int_to_ptr.vmem [resolvable:$true] %s501_s18 }
  0xe6   : > { %s3335_s2 = scalar_lea.hbm %s4685_s15, 16 }
  0xe7   : > { %p3336_p1 = scmp.ne.s32.totalorder %s4685_s15, %s3335_s2  ;;  %p3342_p10 = scmp.lt.u32.totalorder %s3335_s2, %s4685_s15 }
  0xe9   : > { %p3338_p6 = pnand %p3336_p1, %p4011_p4 }
  0xeb   : > { %p3339_p8 = pneg %p3338_p6 }
  0xed   : > { %p3344_p11 = pnand %p3342_p10, %p3339_p8 }
  0xef   : > { %3347 = shalt.err (!%p3344_p11)
}
  0xf0   : > { %s3348_s22 = scalar_lea.vmem %s658_s23, 16  ;;  %s3355_s25 = scalar_lea.vmem %s658_s23, 32 }
  0xf1   : > { %p3349_p12 = scmp.ne.s32.totalorder %s658_s23, %s3348_s22  ;;  %p3356_p13 = scmp.lt.s32.totalorder %s658_s23, %s658_s23 }
  0xf2   : > { %p3357_p3 = scmp.lt.s32.totalorder %s3355_s25, %s3348_s22 }
  0xf3   : > { %p3351_p0 = pnand %p3349_p12, %p4011_p4 }
  0xf4   : > { %p3358_p7 = por %p3357_p3, %p3356_p13 }
  0xf5   : > { %p3352_p5 = pneg %p3351_p0 }
  0xf7   : > { %p3359_p9 = pnand %p3358_p7, %p3352_p5 }
  0xf9   : > { %3362 = shalt.err (!%p3359_p9)
}
  0xfa   : > { %2977 = dma.hbm_to_vmem [thread:$0]  (!%p4740_p2), %s4685_s15, 16, %s658_s23, [#allocation29]  }
  0xfb   : > { %s4746_s2 = sld [smem:[#allocation57_spill]] }
 0x101   : > { %s3363_s30 = scalar_lea.hbm %s4746_s2, 256 }
 0x102   : > { %p3364_p1 = scmp.ne.s32.totalorder %s4746_s2, %s3363_s30  ;;  %p3370_p10 = scmp.lt.u32.totalorder %s3363_s30, %s4746_s2 }
 0x104   : > { %p3366_p6 = pnand %p3364_p1, %p4011_p4 }
 0x106   : > { %p3367_p8 = pneg %p3366_p6 }
 0x108   : > { %p3372_p11 = pnand %p3370_p10, %p3367_p8 }
 0x10a   : > { %3375 = shalt.err (!%p3372_p11)
}
 0x10b   : > { %s3376_s25 = scalar_lea.vmem %s502_s18, 256  ;;  %p3384_p13 = scmp.lt.s32.totalorder %s502_s18, %s502_s18 }
 0x10c   : > { %p3377_p12 = scmp.ne.s32.totalorder %s502_s18, %s3376_s25  ;;  %p3385_p3 = scmp.lt.s32.totalorder %s3376_s25, %s3376_s25 }
 0x10e   : > { %p3379_p0 = pnand %p3377_p12, %p4011_p4  ;;  %p3386_p7 = por %p3385_p3, %p3384_p13 }
 0x110   : > { %p3380_p5 = pneg %p3379_p0 }
 0x112   : > { %p3387_p9 = pnand %p3386_p7, %p3380_p5 }
 0x114   : > { %3390 = shalt.err (!%p3387_p9)
}
 0x115   : > { %s3778_s23 = smov 64   ;;  %s3779_s27 = smov 4  }
 0x116   : > { %2938 = dma.hbm_to_vmem [thread:$0]  (!%p4740_p2), %s4746_s2, 256, %s502_s18, [#allocation8], %s3778_s23, %s3778_s23, %s3779_s27  }
 0x117   : > { %s3780_s21 = smov [#allocation12]   ;;  %s3781_s1 = smov [#allocation15]  }
 0x118   : > { %s525_s30 = sshll.u32 %s3780_s21, 4  ;;  %s549_s3 = sshll.u32 %s3781_s1, 4  ;;  %s526_s30 = int_to_ptr.vmem [resolvable:$true] %s525_s30  ;;  %s550_s3 = int_to_ptr.vmem [resolvable:$true] %s549_s3 }
 0x119   : > { %s3391_s25 = scalar_lea.hbm %s4674_s4, 256 }
 0x11a   : > { %p3392_p1 = scmp.ne.s32.totalorder %s4674_s4, %s3391_s25  ;;  %p3398_p10 = scmp.lt.u32.totalorder %s3391_s25, %s4674_s4 }
 0x11c   : > { %p3394_p6 = pnand %p3392_p1, %p4011_p4 }
 0x11e   : > { %p3395_p8 = pneg %p3394_p6 }
 0x120   : > { %p3400_p11 = pnand %p3398_p10, %p3395_p8 }
 0x122   : > { %3403 = shalt.err (!%p3400_p11)
}
 0x123   : > { %s3404_s18 = scalar_lea.vmem %s526_s30, 256  ;;  %p3412_p13 = scmp.lt.s32.totalorder %s526_s30, %s526_s30 }
 0x124   : > { %p3405_p12 = scmp.ne.s32.totalorder %s526_s30, %s3404_s18  ;;  %p3413_p3 = scmp.lt.s32.totalorder %s3404_s18, %s3404_s18 }
 0x126   : > { %p3407_p0 = pnand %p3405_p12, %p4011_p4  ;;  %p3414_p7 = por %p3413_p3, %p3412_p13 }
 0x128   : > { %p3408_p5 = pneg %p3407_p0 }
 0x12a   : > { %p3415_p9 = pnand %p3414_p7, %p3408_p5 }
 0x12c   : > { %3418 = shalt.err (!%p3415_p9)
}
 0x12d   : > { %2944 = dma.hbm_to_vmem [thread:$0]  (!%p4740_p2), %s4674_s4, 256, %s526_s30, [#allocation11], %s3778_s23, %s3778_s23, %s3779_s27  }
 0x12e   : > { %s3419_s28 = scalar_lea.hbm %s4676_s6, 256 }
 0x12f   : > { %p3420_p1 = scmp.ne.s32.totalorder %s4676_s6, %s3419_s28  ;;  %p3426_p10 = scmp.lt.u32.totalorder %s3419_s28, %s4676_s6 }
 0x131   : > { %p3422_p6 = pnand %p3420_p1, %p4011_p4 }
 0x133   : > { %p3423_p8 = pneg %p3422_p6 }
 0x135   : > { %p3428_p11 = pnand %p3426_p10, %p3423_p8 }
 0x137   : > { %3431 = shalt.err (!%p3428_p11)
}
 0x138   : > { %s3432_s22 = scalar_lea.vmem %s550_s3, 256  ;;  %p3440_p13 = scmp.lt.s32.totalorder %s550_s3, %s550_s3 }
 0x139   : > { %p3433_p12 = scmp.ne.s32.totalorder %s550_s3, %s3432_s22  ;;  %p3441_p3 = scmp.lt.s32.totalorder %s3432_s22, %s3432_s22 }
 0x13b   : > { %p3435_p0 = pnand %p3433_p12, %p4011_p4  ;;  %p3442_p7 = por %p3441_p3, %p3440_p13 }
 0x13d   : > { %p3436_p5 = pneg %p3435_p0 }
 0x13f   : > { %p3443_p9 = pnand %p3442_p7, %p3436_p5 }
 0x141   : > { %3446 = shalt.err (!%p3443_p9)
}
 0x142   : > { %2950 = dma.hbm_to_vmem [thread:$0]  (!%p4740_p2), %s4676_s6, 256, %s550_s3, [#allocation14], %s3778_s23, %s3778_s23, %s3779_s27  }
 0x143   : > { %s3782_s18 = smov [#allocation18]   ;;  %s3783_s7 = smov [#allocation21]  }
 0x144   : > { %s573_s5 = sshll.u32 %s3782_s18, 4  ;;  %s598_s9 = sshll.u32 %s3783_s7, 4  ;;  %s574_s5 = int_to_ptr.vmem [resolvable:$true] %s573_s5  ;;  %s599_s9 = int_to_ptr.vmem [resolvable:$true] %s598_s9 }
 0x145   : > { %s3447_s20 = scalar_lea.hbm %s4678_s8, 256 }
 0x146   : > { %p3448_p1 = scmp.ne.s32.totalorder %s4678_s8, %s3447_s20  ;;  %p3454_p10 = scmp.lt.u32.totalorder %s3447_s20, %s4678_s8 }
 0x148   : > { %p3450_p6 = pnand %p3448_p1, %p4011_p4 }
 0x14a   : > { %p3451_p8 = pneg %p3450_p6 }
 0x14c   : > { %p3456_p11 = pnand %p3454_p10, %p3451_p8 }
 0x14e   : > { %3459 = shalt.err (!%p3456_p11)
}
 0x14f   : > { %s3460_s3 = scalar_lea.vmem %s574_s5, 256  ;;  %p3468_p13 = scmp.lt.s32.totalorder %s574_s5, %s574_s5 }
 0x150   : > { %p3461_p12 = scmp.ne.s32.totalorder %s574_s5, %s3460_s3  ;;  %p3469_p3 = scmp.lt.s32.totalorder %s3460_s3, %s3460_s3 }
 0x152   : > { %p3463_p0 = pnand %p3461_p12, %p4011_p4  ;;  %p3470_p7 = por %p3469_p3, %p3468_p13 }
 0x154   : > { %p3464_p5 = pneg %p3463_p0 }
 0x156   : > { %p3471_p9 = pnand %p3470_p7, %p3464_p5 }
 0x158   : > { %3474 = shalt.err (!%p3471_p9)
}
 0x159   : > { %2956 = dma.hbm_to_vmem [thread:$0]  (!%p4740_p2), %s4678_s8, 256, %s574_s5, [#allocation17], %s3778_s23, %s3778_s23, %s3779_s27  }
 0x15a   : > { %s3475_s11 = scalar_lea.hbm %s4680_s10, 16 }
 0x15b   : > { %p3476_p1 = scmp.ne.s32.totalorder %s4680_s10, %s3475_s11  ;;  %p3482_p10 = scmp.lt.u32.totalorder %s3475_s11, %s4680_s10 }
 0x15d   : > { %p3478_p6 = pnand %p3476_p1, %p4011_p4 }
 0x15f   : > { %p3479_p8 = pneg %p3478_p6 }
 0x161   : > { %p3484_p11 = pnand %p3482_p10, %p3479_p8 }
 0x163   : > { %3487 = shalt.err (!%p3484_p11)
}
 0x164   : > { %s3488_s19 = scalar_lea.vmem %s599_s9, 16  ;;  %s3495_s5 = scalar_lea.vmem %s599_s9, 32 }
 0x165   : > { %p3489_p12 = scmp.ne.s32.totalorder %s599_s9, %s3488_s19  ;;  %p3496_p13 = scmp.lt.s32.totalorder %s599_s9, %s599_s9 }
 0x166   : > { %p3497_p3 = scmp.lt.s32.totalorder %s3495_s5, %s3488_s19 }
 0x167   : > { %p3491_p0 = pnand %p3489_p12, %p4011_p4 }
 0x168   : > { %p3498_p7 = por %p3497_p3, %p3496_p13 }
 0x169   : > { %p3492_p5 = pneg %p3491_p0 }
 0x16b   : > { %p3499_p9 = pnand %p3498_p7, %p3492_p5 }
 0x16d   : > { %3502 = shalt.err (!%p3499_p9)
}
 0x16e   : > { %2962 = dma.hbm_to_vmem [thread:$0]  (!%p4740_p2), %s4680_s10, 16, %s599_s9, [#allocation20]  }
 0x16f   : > { %s3784_s30 = smov [#allocation24]   ;;  %s3785_s18 = smov [#allocation27]  }
 0x170   : > { %s619_s25 = sshll.u32 %s3784_s30, 4  ;;  %s643_s7 = sshll.u32 %s3785_s18, 4  ;;  %s620_s25 = int_to_ptr.vmem [resolvable:$true] %s619_s25  ;;  %s644_s7 = int_to_ptr.vmem [resolvable:$true] %s643_s7 }
 0x171   : > { %s3503_s20 = scalar_lea.hbm %s4682_s12, 256 }
 0x172   : > { %p3504_p1 = scmp.ne.s32.totalorder %s4682_s12, %s3503_s20  ;;  %p3510_p10 = scmp.lt.u32.totalorder %s3503_s20, %s4682_s12 }
 0x174   : > { %p3506_p6 = pnand %p3504_p1, %p4011_p4 }
 0x176   : > { %p3507_p8 = pneg %p3506_p6 }
 0x178   : > { %p3512_p11 = pnand %p3510_p10, %p3507_p8 }
 0x17a   : > { %3515 = shalt.err (!%p3512_p11)
}
 0x17b   : > { %s3516_s9 = scalar_lea.vmem %s620_s25, 256  ;;  %p3524_p13 = scmp.lt.s32.totalorder %s620_s25, %s620_s25 }
 0x17c   : > { %p3517_p12 = scmp.ne.s32.totalorder %s620_s25, %s3516_s9  ;;  %p3525_p3 = scmp.lt.s32.totalorder %s3516_s9, %s3516_s9 }
 0x17e   : > { %p3519_p0 = pnand %p3517_p12, %p4011_p4  ;;  %p3526_p7 = por %p3525_p3, %p3524_p13 }
 0x180   : > { %p3520_p5 = pneg %p3519_p0 }
 0x182   : > { %p3527_p9 = pnand %p3526_p7, %p3520_p5 }
 0x184   : > { %3530 = shalt.err (!%p3527_p9)
}
 0x185   : > { %2968 = dma.hbm_to_vmem [thread:$0]  (!%p4740_p2), %s4682_s12, 256, %s620_s25, [#allocation23], %s3778_s23, %s3778_s23, %s3779_s27  }
 0x186   : > { %s3531_s11 = scalar_lea.hbm %s4684_s14, 512 }
 0x187   : > { %p3532_p1 = scmp.ne.s32.totalorder %s4684_s14, %s3531_s11  ;;  %p3538_p10 = scmp.lt.u32.totalorder %s3531_s11, %s4684_s14 }
 0x189   : > { %p3534_p6 = pnand %p3532_p1, %p4011_p4 }
 0x18b   : > { %p3535_p8 = pneg %p3534_p6 }
 0x18d   : > { %p3540_p11 = pnand %p3538_p10, %p3535_p8 }
 0x18f   : > { %3543 = shalt.err (!%p3540_p11)
}
 0x190   : > { %s3544_s19 = scalar_lea.vmem %s644_s7, 512  ;;  %p3552_p13 = scmp.lt.s32.totalorder %s644_s7, %s644_s7 }
 0x191   : > { %p3545_p12 = scmp.ne.s32.totalorder %s644_s7, %s3544_s19  ;;  %p3553_p3 = scmp.lt.s32.totalorder %s3544_s19, %s3544_s19 }
 0x193   : > { %p3547_p0 = pnand %p3545_p12, %p4011_p4  ;;  %p3554_p7 = por %p3553_p3, %p3552_p13 }
 0x195   : > { %p3548_p5 = pneg %p3547_p0 }
 0x197   : > { %p3555_p9 = pnand %p3554_p7, %p3548_p5 }
 0x199   : > { %3558 = shalt.err (!%p3555_p9)
}
 0x19a   : > { %2974 = dma.hbm_to_vmem [thread:$0]  (!%p4740_p2), %s4684_s14, 512, %s644_s7, [#allocation26], %s3778_s23, %s3778_s23, %s3779_s27  }
 0x19b   : > { %s3786_s9 = smov [#allocation30]   ;;  %s3787_s3 = smov [#allocation31]  }
 0x19c   : > { %s668_s22 = sshll.u32 %s3786_s9, 4  ;;  %s679_s30 = sshll.u32 %s3787_s3, 4  ;;  %s669_s22 = int_to_ptr.vmem [resolvable:$true] %s668_s22  ;;  %s680_s30 = int_to_ptr.vmem [resolvable:$true] %s679_s30 }
 0x19d   : > { %s3559_s28 = scalar_lea.hbm %s4686_s16, 16 }
 0x19e   : > { %p3560_p1 = scmp.ne.s32.totalorder %s4686_s16, %s3559_s28  ;;  %p3566_p10 = scmp.lt.u32.totalorder %s3559_s28, %s4686_s16 }
 0x1a0   : > { %p3562_p6 = pnand %p3560_p1, %p4011_p4 }
 0x1a2   : > { %p3563_p8 = pneg %p3562_p6 }
 0x1a4   : > { %p3568_p11 = pnand %p3566_p10, %p3563_p8 }
 0x1a6   : > { %3571 = shalt.err (!%p3568_p11)
}
 0x1a7   : > { %s3572_s23 = scalar_lea.vmem %s669_s22, 16  ;;  %s3579_s27 = scalar_lea.vmem %s669_s22, 32 }
 0x1a8   : > { %p3573_p12 = scmp.ne.s32.totalorder %s669_s22, %s3572_s23  ;;  %p3580_p13 = scmp.lt.s32.totalorder %s669_s22, %s669_s22 }
 0x1a9   : > { %p3581_p3 = scmp.lt.s32.totalorder %s3579_s27, %s3572_s23 }
 0x1aa   : > { %p3575_p0 = pnand %p3573_p12, %p4011_p4 }
 0x1ab   : > { %p3582_p7 = por %p3581_p3, %p3580_p13 }
 0x1ac   : > { %p3576_p5 = pneg %p3575_p0 }
 0x1ae   : > { %p3583_p9 = pnand %p3582_p7, %p3576_p5 }
 0x1b0   : > { %3586 = shalt.err (!%p3583_p9)
}
 0x1b1   : > { %2980 = dma.hbm_to_vmem [thread:$0]  (!%p4740_p2), %s4686_s16, 16, %s669_s22, [#allocation29]  }
 0x1b2   : > { %s3587_s3 = scalar_lea.hbm %s4687_s17, 16 }
 0x1b3   : > { %p3588_p1 = scmp.ne.s32.totalorder %s4687_s17, %s3587_s3  ;;  %p3594_p10 = scmp.lt.u32.totalorder %s3587_s3, %s4687_s17 }
 0x1b5   : > { %p3590_p6 = pnand %p3588_p1, %p4011_p4 }
 0x1b7   : > { %p3591_p8 = pneg %p3590_p6 }
 0x1b9   : > { %p3596_p11 = pnand %p3594_p10, %p3591_p8 }
 0x1bb   : > { %3599 = shalt.err (!%p3596_p11)
}
 0x1bc   : > { %s3600_s21 = scalar_lea.vmem %s680_s30, 16  ;;  %s3607_s22 = scalar_lea.vmem %s680_s30, 32 }
 0x1bd   : > { %p3601_p12 = scmp.ne.s32.totalorder %s680_s30, %s3600_s21  ;;  %p3608_p13 = scmp.lt.s32.totalorder %s680_s30, %s680_s30 }
 0x1be   : > { %p3609_p3 = scmp.lt.s32.totalorder %s3607_s22, %s3600_s21 }
 0x1bf   : > { %p3603_p0 = pnand %p3601_p12, %p4011_p4 }
 0x1c0   : > { %p3610_p7 = por %p3609_p3, %p3608_p13 }
 0x1c1   : > { %p3604_p5 = pneg %p3603_p0 }
 0x1c3   : > { %p3611_p9 = pnand %p3610_p7, %p3604_p5 }
 0x1c5   : > { %3614 = shalt.err (!%p3611_p9)
}
 0x1c6   : > { %s4747_s23 = sld [smem:[#allocation47_spill]]  ;;  %s4748_s27 = sld [smem:[#allocation49_spill]] }
 0x1c7   : > { %s4749_s7 = sld [smem:[#allocation51_spill]]  ;;  %s62_s26 = sadd.s32 1, %s3755_s29 }
 0x1c8   : > { %2983 = dma.hbm_to_vmem [thread:$0]  (!%p4740_p2), %s4687_s17, 16, %s680_s30, [#allocation32]  }
 0x1c9   : > { %s55_s25 = sadd.s32 1, %s3763_s0  ;;  %s690_s5 = sand.u32 1, %s3755_s29  }
 0x1ca   : > { %p57_p1 = scmp.ge.s32.totalorder %s55_s25, 2  ;;  %s2654_s30 = sshll.u32 %s690_s5, 3 }
 0x1cb   : > { %s2655_s3 = sshll.u32 %s3763_s0, 7  ;;  %s4752_s20 = sld [smem:[#allocation55_spill]] }
 0x1cc   : > { %p69_p4 = scmp.ne.s32.totalorder %s3755_s29, %s4747_s23  ;;  %p70_p6 = scmp.eq.s32.totalorder %s4748_s27, 0 }
 0x1cd   : > { %p4750_p8 = scmp.ne.s32.totalorder %s4749_s7, 0  ;;  %p3008_p11 = scmp.lt.s32.totalorder %s4748_s27, 2 }
 0x1ce   : > { %s4774_s25 = smov (%p57_p1, %s55_s25), 0  ;;  %p71_p12 = por %p70_p6, %p69_p4 }
 0x1cf   : > { %p4322_p10 = por %p4750_p8, %p69_p4  ;;  %s59_s9 = ssub.s32 %s3763_s0, %s4774_s25 }
 0x1d0   : > { %p60_p0 = scmp.eq.s32.totalorder %s59_s9, 0  ;;  %s694_s22 = scalar_lea.vmem [#allocation4], %s2654_s30 }
 0x1d1   : > { %s4339_s21 = scalar_lea.hbm %s4752_s20, %s2655_s3  ;;  %s701_s1 = sshll.u32 %s694_s22, 4  ;;  %s4341_s1 = int_to_ptr.vmem [resolvable:$true] %s701_s1 }
 0x1d2   : > { %s4334_s18 = scalar_select %p60_p0, %s3755_s29, %s62_s26  }
 0x1d3   : > { %p4345_p2 = pnand %p3008_p11, %p71_p12  ;;  %s691_s23 = scalar_lea.sflag [#allocation5], %s690_s5 }
 0x1d4   : > { %s3615_s7 = scalar_lea.hbm %s4339_s21, 128  ;;  %s3620_s30 = scalar_lea.hbm %s4752_s20, 256 }
 0x1d5   : > { %p3616_p5 = scmp.ne.s32.totalorder %s4339_s21, %s3615_s7  ;;  %p3617_p13 = pneg %p4345_p2 }
 0x1d6   : > { %p3621_p9 = scmp.lt.u32.totalorder %s4339_s21, %s4752_s20  ;;  %p3622_p4 = scmp.lt.u32.totalorder %s3620_s30, %s3615_s7 }
 0x1d7   : > { %p3618_p3 = pnand %p3617_p13, %p3616_p5  ;;  %p3624_p6 = scmp.lt.u32.totalorder %s3615_s7, %s4339_s21 }
 0x1d8   : > { %p3623_p1 = por %p3622_p4, %p3621_p9 }
 0x1d9   : > { %p3619_p7 = pneg %p3618_p3 }
 0x1da   : > { %p3625_p8 = por %p3624_p6, %p3623_p1 }
 0x1dc   : > { %p3626_p11 = pnand %p3625_p8, %p3619_p7 }
 0x1de   : > { %3629 = shalt.err (!%p3626_p11)
}
 0x1df   : > { %s3630_s5 = scalar_lea.vmem %s4341_s1, 128  ;;  %s3788_s11 = smov [#allocation4]  }
 0x1e0   : > { %p3631_p12 = scmp.ne.s32.totalorder %s4341_s1, %s3630_s5  ;;  %s3635_s28 = sshll.u32 %s3788_s11, 4  ;;  %s3636_s28 = int_to_ptr.vmem [resolvable:$false] %s3635_s28 }
 0x1e1   : > { %s3637_s22 = scalar_lea.vmem %s3636_s28, 256  ;;  %p3638_p3 = scmp.lt.s32.totalorder %s4341_s1, %s3636_s28 }
 0x1e2   : > { %p3633_p0 = pnand %p3631_p12, %p3617_p13  ;;  %p3639_p9 = scmp.lt.s32.totalorder %s3637_s22, %s3630_s5 }
 0x1e4   : > { %p3634_p5 = pneg %p3633_p0  ;;  %p3640_p4 = por %p3639_p9, %p3638_p3 }
 0x1e6   : > { %p3641_p1 = pnand %p3640_p4, %p3634_p5 }
 0x1e8   : > { %3644 = shalt.err (!%p3641_p1)
}
 0x1e9   : > { %2987 = dma.hbm_to_vmem [thread:$0]  (!%p4345_p2), %s4339_s21, 128, %s4341_s1, %s691_s23  }
 0x1ea   : > { %s4754_s7 = sld [smem:[#allocation54_spill]] }
 0x1f0   : > { %p4755_p7 = scmp.ne.s32.totalorder %s4754_s7, 0 }
 0x1f1   : > { %s4756_s26 = sld [smem:[#allocation47_spill]] (!%p4755_p7)  ;;  %s4757_s9 = sld [smem:[#allocation52_spill]] (!%p4755_p7) }
 0x1f2   : > { %710 = sbr.rel (%p4755_p7) target bundleno = 2942 (0xb7e), region = 92 }
 0x1f7   : > { %s4377_s30 = sand.u32 (!%p4755_p7), 1, %s4756_s26   ;;  %p4758_p13 = scmp.ne.s32.totalorder (!%p4755_p7), %s4757_s9, 0 }
 0x1f8   : > { %s2657_s27 = sshll.u32 (!%p4755_p7), %s4377_s30, 3  ;;  %s713_s3 = scalar_lea.sflag (!%p4755_p7), [#allocation5], %s4377_s30 }
 0x1f9   : > { %s4383_s5 = scalar_lea.vmem [#allocation4], %s2657_s27 }
 0x1fa   : > { %3698 = dma.done.wait (%p4758_p13), %s713_s3, 128  }
 0x1fb   : > { %3700 = vsyncadd (%p4758_p13), %s713_s3, 4294967168 }
 0x1fc   : > { %3702 = dma.done.wait (%p4758_p13), [#allocation8], 16  }
 0x1fd   : > { %3704 = vsyncadd (%p4758_p13), [#allocation8], 4294967280  ;;  %s4759_s21 = sld [smem:[#allocation50_spill]] }
 0x203   : > { %p4760_p2 = scmp.ne.s32.totalorder %s4759_s21, 0 }
 0x205   : > { %3706 = dma.done.wait (%p4760_p2), [#allocation8], 256  }
 0x206   : > { %3708 = vsyncadd (%p4760_p2), [#allocation8], 4294967040 }
 0x207   : > { %3710 = dma.done.wait (%p4760_p2), [#allocation11], 272  }
 0x208   : > { %3712 = vsyncadd (%p4760_p2), [#allocation11], 4294967024 }
 0x209   : > { %3714 = dma.done.wait (%p4760_p2), [#allocation14], 272  }
 0x20a   : > { %3716 = vsyncadd (%p4760_p2), [#allocation14], 4294967024 }
 0x20b   : > { %3718 = dma.done.wait (%p4760_p2), [#allocation17], 272  }
 0x20c   : > { %3720 = vsyncadd (%p4760_p2), [#allocation17], 4294967024 }
 0x20d   : > { %3722 = dma.done.wait (%p4760_p2), [#allocation20], 32  }
 0x20e   : > { %3724 = vsyncadd (%p4760_p2), [#allocation20], 4294967264 }
 0x20f   : > { %3726 = dma.done.wait (%p4760_p2), [#allocation23], 272  }
 0x210   : > { %3728 = vsyncadd (%p4760_p2), [#allocation23], 4294967024 }
 0x211   : > { %3730 = dma.done.wait (%p4760_p2), [#allocation26], 528  }
 0x212   : > { %3732 = vsyncadd (%p4760_p2), [#allocation26], 4294966768 }
 0x213   : > { %3734 = dma.done.wait (%p4760_p2), [#allocation29], 32  }
 0x214   : > { %3736 = vsyncadd (%p4760_p2), [#allocation29], 4294967264 }
 0x215   : > { %3738 = dma.done.wait (%p4760_p2), [#allocation32], 16  }
 0x216   : > { %3740 = vsyncadd (%p4760_p2), [#allocation32], 4294967280  ;;  %v3789_v0 = vmov 0.0   ;;  %vm3790_vm0 = vmmov 0   ;;  %v3103_v1 = vld [vmem:[#allocation12] sm:$0xff]   ;;  %v3104_v2 = vld [vmem:[#allocation12 + $0x8] sm:$0xff]   ;;  %v989_v29 = vlaneseq }
 0x217   : > { %2762 = vmatprep.subr.bf16.mxu0 %v3789_v0  ;;  %2766 = vmatprep.mubr.msk.bf16.mxu0 %vm3790_vm0, %v3789_v0  ;;  %v4436_v3 = vld [vmem:[%s4383_s5] sm:$0xff]  ;;  %vm867_vm1 = vcmask 261120   ;;  %v3105_v5 = vld [vmem:[#allocation9] sm:$0xff]   ;;  %s3791_s1 = smov 104   ;;  %s3792_s19 = smov 120   ;;  %vm1124_vm2 = vcmask 60416  }
 0x218   : > { %2770 = vmatprep.subr.bf16.mxu1 %v3789_v0  ;;  %2774 = vmatprep.mubr.msk.bf16.mxu1 %vm3790_vm0, %v3789_v0  ;;  %v843_v4 = vpack.c.bf16 %v4436_v3, %v4436_v3  ;;  %v3107_v6 = vld [vmem:[#allocation15] sm:$0xff]   ;;  %v3108_v8 = vld [vmem:[#allocation15 + $0x8] sm:$0xff]   ;;  %v2675_v9 = vld [vmem:[#allocation13] ss:$0 sm:$0xff]  ;;  %s3793_s23 = smov 112   ;;  %v4465_v33 = vshrl.u32 %v989_v29, 7 }
 0x219   : > { %2763 = vmatpush3.bf16.msra.mxu0 %v3103_v1  ;;  %2771 = vmatpush3.bf16.msra.mxu1 %v3107_v6  ;;  %v3106_v7 = vld [vmem:[#allocation9 + $0x8] sm:$0xff]   ;;  %v2687_v15 = vld [vmem:[#allocation10] ss:$0 sm:$0xff]  ;;  %v2679_v21 = vld [vmem:[#allocation16] ss:$0 sm:$0xff]  ;;  %vm1517_vm3 = vcmask 64512  }
 0x21a   : > { %2764 = vmatprep.subr.bf16.mxu0 %v3789_v0  ;;  %2772 = vmatprep.subr.bf16.mxu1 %v3789_v0  ;;  %v3794_v27 = vmov 1983009808   ;;  %v3795_v30 = vmov 1934713408   ;;  %vm1749_vm4 = vcmask 1043456   ;;  %s3796_s11 = smov 16  }
 0x21b   : > { %v987_v28 = vunpack.c.l.s4 %v3794_v27  ;;  %v1019_v31 = vunpack.c.l.s4 %v3795_v30  ;;  %s3797_s28 = smov 8   ;;  %s3798_s22 = smov 24   ;;  %vm2088_vm5 = vcmask 130048   ;;  %vm2090_vm6 = vcmask 195584  }
 0x21c   : > { %vm2298_vm7 = vcmask 523264   ;;  %s4761_s7 = sld [smem:[#allocation48_spill]]  ;;  %s836_s9 = scalar_lea.vmem [#allocation33], %s2657_s27 }
 0x21d   : > { %2765 = vmatpush3.bf16.msra.mxu0 %v3104_v2  ;;  %2773 = vmatpush3.bf16.msra.mxu1 %v3108_v8  ;;  %v988_v32 = vunpack.c.0.s8 %v987_v28  ;;  %v1020_v36 = vunpack.c.0.s8 %v1019_v31  ;;  %s2388_s3 = sshll.u32 %s836_s9, 4  ;;  %s3799_s27 = smov [#allocation33]   ;;  %s4622_s3 = int_to_ptr.vmem [resolvable:$true] %s2388_s3 }
 0x21e   : > { %2778 = vmatprep.subr.bf16.mxu0 %v3789_v0  ;;  %2786 = vmatprep.subr.bf16.mxu1 %v3789_v0 }
 0x21f   : > { %v4468_v37 = vsub.s32 %v988_v32, %v4465_v33  ;;  %v4471_v43 = vsub.s32 %v1020_v36, %v4465_v33 }
 0x220   : > { %2767 = vmatmul.mubr.msk.bf16.vlgmr.msra.gmra.mrb[0].mxu0 %vm867_vm1, %v843_v4  ;;  %2775 = vmatmul.mubr.msk.bf16.vlgmr.msra.gmra.mrb[0].mxu1 %vm867_vm1, %v843_v4 }
 0x221   : > { %2779 = vmatpush3.bf16.msra.mxu0 %v3105_v5  ;;  %2782 = vmatprep.mubr.msk.bf16.mxu0 %vm3790_vm0, %v3789_v0 }
 0x222   : > { %2780 = vmatprep.subr.bf16.mxu0 %v3789_v0  ;;  %2788 = vmatprep.mubr.msk.bf16.mxu1 %vm3790_vm0, %v3789_v0  ;;  %s2723_s26 = sshll.u32 %s4761_s7, 7 }
 0x225   : > { %2781 = vmatpush3.bf16.msra.mxu0 %v3106_v7 }
 0x226   : > { %2792 = vmatprep.subr.bf16.mxu0 %v3789_v0 }
 0x228   : > { %2783 = vmatmul.mubr.msk.bf16.vlgmr.msra.gmra.mrb[4].mxu0 %vm867_vm1, %v843_v4 }
 0x229   : > { %2794 = vmatprep.mubr.msk.bf16.mxu0 %vm3790_vm0, %v3789_v0 }
 0x2f3   : > { %v905_v10 = vpop.f32.mrb[0].mxu0  ;;  %v968_v22 = vpop.f32.mrb[0].mxu1 }
 0x2f4   : > { %v906_v11 = vadd.f32 %v2675_v9, %v905_v10  ;;  %v2768_v12 = vpop.f32.mrb[1].mxu0  ;;  %v4460_v23 = vadd.f32 %v2679_v21, %v968_v22  ;;  %v2776_v24 = vpop.f32.mrb[1].mxu1 }
 0x2f5   : > { %v908_v13 = vpop.f32.mrb[2].mxu0  ;;  %v971_v25 = vpop.f32.mrb[2].mxu1 }
 0x2f6   : > { %981 = vrot.lane.b32.xlu1 %v906_v11, %s3791_s1  ;;  %975 = vrot.lane.b32.xlu0 %v906_v11, %s3792_s19  ;;  %v2769_v14 = vpop.f32.mrb[3].mxu0  ;;  %v2777_v26 = vpop.f32.mrb[3].mxu1 }
 0x2fa   : > { %978 = vrot.lane.b32.xlu0 %v906_v11, %s3793_s23 }
 0x2fb   : > { %v1349_v16 = vpop.f32.mrb[4].mxu0 }
 0x2fc   : > { %v4455_v17 = vadd.f32 %v2687_v15, %v1349_v16  ;;  %v2784_v18 = vpop.f32.mrb[5].mxu0 }
 0x2fd   : > { %v1352_v19 = vpop.f32.mrb[6].mxu0 }
 0x2fe   : > { %1359 = vrot.lane.b32.xlu0 %v4455_v17, %s3793_s23  ;;  %1356 = vrot.lane.b32.xlu1 %v4455_v17, %s3792_s19  ;;  %v2785_v20 = vpop.f32.mrb[7].mxu0 }
 0x302   : > { %1362 = vrot.lane.b32.xlu1 %v4455_v17, %s3791_s1  ;;  %1130 = vrot.lane.b32.xlu0 %v4460_v23, %s3792_s19 }
 0x306   : > { %1133 = vrot.lane.b32.xlu1 %v4460_v23, %s3793_s23  ;;  %1136 = vrot.lane.b32.xlu0 %v4460_v23, %s3791_s1  ;;  %s4762_s1 = sld [smem:[#allocation63_spill]]  ;;  %s2374_s23 = scalar_lea.sflag [#allocation6], %s4377_s30 }
 0x30c   : > { %s4620_s19 = scalar_lea.hbm %s4762_s1, %s2723_s26 }
 0x368   : > { %v982_v34 = vpop.permute.xlu1 %981  ;;  %v976_v35 = vpop.permute.xlu0 %975 }
 0x369   : > { %v1000_v38 = vcombine.low %v976_v35, %v982_v34  ;;  %v1001_v39 = vcombine.high %v976_v35, %v982_v34 }
 0x36b   : > { %v1008_v44 = vrot.slane %v1000_v38, %v4468_v37  ;;  %v1015_v45 = vrot.slane %v1001_v39, %v4468_v37 }
 0x36c   : > { %v979_v40 = vpop.permute.xlu0 %978 }
 0x36d   : > { %v984_v41 = vcombine.low %v906_v11, %v979_v40  ;;  %v985_v42 = vcombine.high %v906_v11, %v979_v40 }
 0x36f   : > { %v992_v46 = vrot.slane %v984_v41, %v4468_v37  ;;  %v999_v47 = vrot.slane %v985_v42, %v4468_v37 }
 0x370   : > { %v1357_v48 = vpop.permute.xlu1 %1356  ;;  %v1360_v53 = vpop.permute.xlu0 %1359 }
 0x371   : > { %v1016_v49 = vcombine.low %v992_v46, %v1008_v44  ;;  %v1017_v50 = vcombine.high %v992_v46, %v1008_v44  ;;  %v1032_v51 = vcombine.low %v999_v47, %v1015_v45  ;;  %v1033_v52 = vcombine.high %v999_v47, %v1015_v45 }
 0x372   : > { %v1365_v58 = vcombine.low %v4455_v17, %v1360_v53  ;;  %v1366_v59 = vcombine.high %v4455_v17, %v1360_v53 }
 0x373   : > { %v1024_v54 = vrot.slane %v1016_v49, %v4471_v43  ;;  %v1031_v55 = vrot.slane %v1017_v50, %v4471_v43  ;;  %v1040_v56 = vrot.slane %v1032_v51, %v4471_v43  ;;  %v1047_v57 = vrot.slane %v1033_v52, %v4471_v43 }
 0x374   : > { %v1363_v60 = vpop.permute.xlu1 %1362  ;;  %v1373_v9 = vrot.slane %v1365_v58, %v4468_v37  ;;  %v1380_v10 = vrot.slane %v1366_v59, %v4468_v37 }
 0x375   : > { %v1052_v61 = vcombine.low %v1024_v54, %v1031_v55  ;;  %v2683_v62 = vcombine.high %v1024_v54, %v1031_v55  ;;  %v1068_v63 = vcombine.low %v1040_v56, %v1047_v57  ;;  %v2684_v1 = vcombine.high %v1040_v56, %v1047_v57 }
 0x376   : > { %v1381_v2 = vcombine.low %v1357_v48, %v1363_v60  ;;  %v1382_v4 = vcombine.high %v1357_v48, %v1363_v60 }
 0x377   : > { %v1059_v5 = vrot.slane %v1052_v61, %v4468_v37  ;;  %v1067_v6 = vrot.slane %v2683_v62, %v4468_v37  ;;  %v1075_v7 = vrot.slane %v1068_v63, %v4468_v37  ;;  %v1083_v8 = vrot.slane %v2684_v1, %v4468_v37 }
 0x378   : > { %v1389_v11 = vrot.slane %v1381_v2, %v4468_v37  ;;  %v1396_v12 = vrot.slane %v1382_v4, %v4468_v37 }
 0x379   : > { %v1084_v13 = vcombine.low %v1059_v5, %v1067_v6  ;;  %v1085_v14 = vcombine.high %v1059_v5, %v1067_v6  ;;  %v1100_v15 = vcombine.low %v1075_v7, %v1083_v8  ;;  %v1101_v16 = vcombine.high %v1075_v7, %v1083_v8 }
 0x37a   : > { %v1397_v17 = vcombine.low %v1373_v9, %v1389_v11  ;;  %v1398_v18 = vcombine.high %v1373_v9, %v1389_v11  ;;  %v1413_v19 = vcombine.low %v1380_v10, %v1396_v12  ;;  %v1414_v20 = vcombine.high %v1380_v10, %v1396_v12  ;;  %v1131_v11 = vpop.permute.xlu0 %1130  ;;  %v1134_v12 = vpop.permute.xlu1 %1133 }
 0x37b   : > { %v1092_v21 = vrot.slane %v1084_v13, %v4471_v43  ;;  %v1099_v22 = vrot.slane %v1085_v14, %v4471_v43  ;;  %v1108_v24 = vrot.slane %v1100_v15, %v4471_v43  ;;  %v1115_v25 = vrot.slane %v1101_v16, %v4471_v43 }
 0x37c   : > { %v1405_v26 = vrot.slane %v1397_v17, %v4471_v43  ;;  %v1412_v27 = vrot.slane %v1398_v18, %v4471_v43  ;;  %v1421_v28 = vrot.slane %v1413_v19, %v4471_v43  ;;  %v1428_v29 = vrot.slane %v1414_v20, %v4471_v43 }
 0x37d   : > { %v1116_v30 = vcombine.low %v1092_v21, %v1108_v24  ;;  %v1117_v31 = vcombine.high %v1092_v21, %v1108_v24  ;;  %v1118_v32 = vcombine.low %v1099_v22, %v1115_v25  ;;  %v1119_v34 = vcombine.high %v1099_v22, %v1115_v25 }
 0x37e   : > { %v1433_v35 = vcombine.low %v1405_v26, %v1412_v27  ;;  %v2691_v36 = vcombine.high %v1405_v26, %v1412_v27  ;;  %v1449_v38 = vcombine.low %v1421_v28, %v1428_v29  ;;  %v2692_v39 = vcombine.high %v1421_v28, %v1428_v29  ;;  %v1137_v15 = vpop.permute.xlu0 %1136 }
 0x37f   : > { %v1120_v40 = vpack.c.bf16 %v1116_v30, %v1116_v30  ;;  %v1121_v41 = vpack.c.bf16 %v1117_v31, %v1117_v31  ;;  %v1122_v42 = vpack.c.bf16 %v1118_v32, %v1118_v32  ;;  %v1123_v44 = vpack.c.bf16 %v1119_v34, %v1119_v34 }
 0x380   : > { %v1440_v45 = vrot.slane %v1433_v35, %v4468_v37  ;;  %v1448_v46 = vrot.slane %v2691_v36, %v4468_v37  ;;  %v1456_v47 = vrot.slane %v1449_v38, %v4468_v37  ;;  %v1464_v48 = vrot.slane %v2692_v39, %v4468_v37 }
 0x381   : > { %1125 = vst.msk [vmem:[#allocation2] sm:$0xf] %vm1124_vm2, %v1120_v40  ;;  %1126 = vst.msk [vmem:[#allocation2 + $0x4] sm:$0xf] %vm1124_vm2, %v1121_v41  ;;  %v1139_v13 = vcombine.low %v4460_v23, %v1134_v12  ;;  %v1140_v14 = vcombine.high %v4460_v23, %v1134_v12  ;;  %v1155_v16 = vcombine.low %v1131_v11, %v1137_v15 }
 0x382   : > { %1127 = vst.msk [vmem:[#allocation2 + $0x8] sm:$0xf] %vm1124_vm2, %v1122_v42  ;;  %1128 = vst.msk [vmem:[#allocation2 + $0xc] sm:$0xf] %vm1124_vm2, %v1123_v44  ;;  %v1465_v49 = vcombine.low %v1440_v45, %v1448_v46  ;;  %v1481_v50 = vcombine.low %v1456_v47, %v1464_v48  ;;  %v1466_v57 = vcombine.high %v1440_v45, %v1448_v46 }
 0x383   : > { %v1482_v58 = vcombine.high %v1456_v47, %v1464_v48  ;;  %v1156_v17 = vcombine.high %v1131_v11, %v1137_v15  ;;  %v1147_v18 = vrot.slane %v1139_v13, %v4468_v37  ;;  %v1154_v19 = vrot.slane %v1140_v14, %v4468_v37 }
 0x384   : > { %v1473_v51 = vrot.slane %v1465_v49, %v4471_v43  ;;  %v1489_v52 = vrot.slane %v1481_v50, %v4471_v43  ;;  %v1480_v2 = vrot.slane %v1466_v57, %v4471_v43  ;;  %v1163_v20 = vrot.slane %v1155_v16, %v4468_v37 }
 0x385   : > { %v1496_v4 = vrot.slane %v1482_v58, %v4471_v43  ;;  %v1170_v21 = vrot.slane %v1156_v17, %v4468_v37 }
 0x386   : > { %v1497_v59 = vcombine.low %v1473_v51, %v1489_v52  ;;  %v1498_v60 = vcombine.high %v1473_v51, %v1489_v52  ;;  %v1171_v22 = vcombine.low %v1147_v18, %v1163_v20  ;;  %v1172_v24 = vcombine.high %v1147_v18, %v1163_v20 }
 0x387   : > { %v1499_v7 = vcombine.low %v1480_v2, %v1496_v4  ;;  %v1500_v8 = vcombine.high %v1480_v2, %v1496_v4  ;;  %v1187_v25 = vcombine.low %v1154_v19, %v1170_v21  ;;  %v1188_v26 = vcombine.high %v1154_v19, %v1170_v21 }
 0x388   : > { %v1505_v53 = vld [vmem:[#allocation2] sm:$0xf]  ;;  %v1506_v54 = vld [vmem:[#allocation2 + $0x4] sm:$0xf]  ;;  %v1501_v63 = vpack.c.bf16 %v1497_v59, %v1497_v59  ;;  %v1502_v1 = vpack.c.bf16 %v1498_v60, %v1498_v60  ;;  %v1179_v27 = vrot.slane %v1171_v22, %v4471_v43  ;;  %v1186_v28 = vrot.slane %v1172_v24, %v4471_v43 }
 0x389   : > { %v1522_v55 = vsel %vm1517_vm3, %v1505_v53, 0  ;;  %v1568_v56 = vsel %vm1517_vm3, %v1506_v54, 0  ;;  %v1507_v61 = vld [vmem:[#allocation2 + $0x8] sm:$0xf]  ;;  %v1508_v62 = vld [vmem:[#allocation2 + $0xc] sm:$0xf]  ;;  %v1503_v9 = vpack.c.bf16 %v1499_v7, %v1499_v7  ;;  %v1504_v10 = vpack.c.bf16 %v1500_v8, %v1500_v8 }
 0x38a   : > { %2787 = vmatpush3.bf16.xpose.msra.mxu1 %v1522_v55  ;;  %2793 = vmatpush3.bf16.xpose.msra.mxu0 %v1568_v56  ;;  %v1614_v5 = vsel %vm1517_vm3, %v1507_v61, 0  ;;  %v1660_v6 = vsel %vm1517_vm3, %v1508_v62, 0  ;;  %v1195_v23 = vrot.slane %v1187_v25, %v4471_v43  ;;  %v1202_v29 = vrot.slane %v1188_v26, %v4471_v43  ;;  %v1286_v61 = vld [vmem:[#allocation7] sm:$0x1] }
 0x38b   : > { %2798 = vmatprep.subr.bf16.mxu1 %v3789_v0  ;;  %2804 = vmatprep.subr.bf16.mxu0 %v3789_v0  ;;  %v1207_v30 = vcombine.low %v1179_v27, %v1186_v28  ;;  %v2685_v31 = vcombine.high %v1179_v27, %v1186_v28  ;;  %v2693_v62 = vadd.f32 -1.0, %v1286_v61 }
 0x38c   : > { %v1223_v32 = vcombine.low %v1195_v23, %v1202_v29  ;;  %v2686_v34 = vcombine.high %v1195_v23, %v1202_v29 }
 0x38d   : > { %v1214_v35 = vrot.slane %v1207_v30, %v4468_v37  ;;  %v1222_v36 = vrot.slane %v2685_v31, %v4468_v37 }
 0x38e   : > { %v1230_v38 = vrot.slane %v1223_v32, %v4468_v37  ;;  %v1238_v39 = vrot.slane %v2686_v34, %v4468_v37 }
 0x38f   : > { %v1239_v40 = vcombine.low %v1214_v35, %v1222_v36  ;;  %v1240_v41 = vcombine.high %v1214_v35, %v1222_v36 }
 0x390   : > { %v1255_v42 = vcombine.low %v1230_v38, %v1238_v39  ;;  %v1256_v44 = vcombine.high %v1230_v38, %v1238_v39 }
 0x391   : > { %2789 = vmatmul.mubr.msk.bf16.vlgmr.msra.gmra.mrb[4].mxu1 %vm1517_vm3, %v1501_v63  ;;  %2795 = vmatmul.mubr.msk.bf16.vlgmr.msra.gmra.mrb[8].mxu0 %vm1517_vm3, %v1502_v1  ;;  %v1247_v45 = vrot.slane %v1239_v40, %v4471_v43  ;;  %v1254_v46 = vrot.slane %v1240_v41, %v4471_v43  ;;  %v1510_v63 = vmul.f32 1e+30, %v2693_v62  ;;  %v1514_v1 = vsub.s32 0, %v4465_v33 }
 0x392   : > { %2799 = vmatpush3.bf16.xpose.msra.mxu1 %v1614_v5  ;;  %2805 = vmatpush3.bf16.xpose.msra.mxu0 %v1660_v6  ;;  %v1263_v47 = vrot.slane %v1255_v42, %v4471_v43  ;;  %v1270_v48 = vrot.slane %v1256_v44, %v4471_v43 }
 0x393   : > { %2800 = vmatprep.mubr.msk.bf16.mxu1 %vm3790_vm0, %v3789_v0  ;;  %2806 = vmatprep.mubr.msk.bf16.mxu0 %vm3790_vm0, %v3789_v0  ;;  %v1515_v2 = vrot.slane %v1510_v63, %v1514_v1 }
 0x394   : > { %2810 = vmatprep.subr.bf16.mxu1 %v3789_v0  ;;  %2816 = vmatprep.subr.bf16.mxu0 %v3789_v0  ;;  %v1271_v49 = vcombine.low %v1247_v45, %v1263_v47  ;;  %v1272_v50 = vcombine.high %v1247_v45, %v1263_v47  ;;  %v1273_v51 = vcombine.low %v1254_v46, %v1270_v48 }
 0x395   : > { %v1274_v52 = vcombine.high %v1254_v46, %v1270_v48 }
 0x396   : > { %v1275_v53 = vpack.c.bf16 %v1271_v49, %v1271_v49  ;;  %v1276_v54 = vpack.c.bf16 %v1272_v50, %v1272_v50  ;;  %v1277_v55 = vpack.c.bf16 %v1273_v51, %v1273_v51 }
 0x397   : > { %v1278_v56 = vpack.c.bf16 %v1274_v52, %v1274_v52 }
 0x398   : > { %1279 = vst.msk [vmem:[#allocation3] sm:$0xf] %vm1124_vm2, %v1275_v53  ;;  %1280 = vst.msk [vmem:[#allocation3 + $0x4] sm:$0xf] %vm1124_vm2, %v1276_v54 }
 0x399   : > { %2801 = vmatmul.mubr.msk.bf16.vlgmr.msra.gmra.mrb[8].mxu1 %vm1517_vm3, %v1503_v9  ;;  %2807 = vmatmul.mubr.msk.bf16.vlgmr.msra.gmra.mrb[12].mxu0 %vm1517_vm3, %v1504_v10  ;;  %1281 = vst.msk [vmem:[#allocation3 + $0x8] sm:$0xf] %vm1124_vm2, %v1277_v55  ;;  %1282 = vst.msk [vmem:[#allocation3 + $0xc] sm:$0xf] %vm1124_vm2, %v1278_v56 }
 0x39a   : > { %2812 = vmatprep.mubr.msk.bf16.mxu1 %vm3790_vm0, %v3789_v0  ;;  %2818 = vmatprep.mubr.msk.bf16.mxu0 %vm3790_vm0, %v3789_v0 }
 0x39f   : > { %v1742_v57 = vld [vmem:[#allocation3] sm:$0xf]  ;;  %v1743_v58 = vld [vmem:[#allocation3 + $0x4] sm:$0xf] }
 0x3a0   : > { %v1751_v59 = vsel %vm1749_vm4, %v1742_v57, 0  ;;  %v1797_v60 = vsel %vm1749_vm4, %v1743_v58, 0  ;;  %v1744_v42 = vld [vmem:[#allocation3 + $0x8] sm:$0xf]  ;;  %v1745_v47 = vld [vmem:[#allocation3 + $0xc] sm:$0xf] }
 0x3a1   : > { %2811 = vmatpush3.bf16.msra.mxu1 %v1751_v59  ;;  %2817 = vmatpush3.bf16.msra.mxu0 %v1797_v60  ;;  %v1843_v50 = vsel %vm1749_vm4, %v1744_v42, 0  ;;  %v1889_v51 = vsel %vm1749_vm4, %v1745_v47, 0  ;;  %v3110_v47 = vld [vmem:[#allocation18 + $0x8] sm:$0xff]  }
 0x3a2   : > { %2822 = vmatprep.subr.bf16.mxu1 %v3789_v0  ;;  %2828 = vmatprep.subr.bf16.mxu0 %v3789_v0 }
 0x464   : > { %v1558_v4 = vpop.f32.mrb[4].mxu1  ;;  %v1604_v5 = vpop.f32.mrb[8].mxu0 }
 0x465   : > { %v1559_v6 = vadd.f32 %v1558_v4, %v1515_v2  ;;  %v1605_v7 = vadd.f32 %v1604_v5, %v1515_v2  ;;  %v2790_v8 = vpop.f32.mrb[5].mxu1  ;;  %v2796_v9 = vpop.f32.mrb[9].mxu0 }
 0x466   : > { %v1561_v10 = vpop.f32.mrb[6].mxu1  ;;  %v1607_v11 = vpop.f32.mrb[10].mxu0 }
 0x467   : > { %v2791_v12 = vpop.f32.mrb[7].mxu1  ;;  %v2797_v13 = vpop.f32.mrb[11].mxu0  ;;  %v1702_v14 = vsel %vm1517_vm3, %v1559_v6, -inf  ;;  %v1705_v15 = vsel %vm1517_vm3, %v1605_v7, -inf }
 0x468   : > { %1703 = vmax.xlane.f32.xlu1 %v1702_v14  ;;  %1706 = vmax.xlane.f32.xlu0 %v1705_v15 }
 0x46c   : > { %v1650_v16 = vpop.f32.mrb[8].mxu1  ;;  %v1696_v17 = vpop.f32.mrb[12].mxu0 }
 0x46d   : > { %v1651_v33 = vadd.f32 %v1650_v16, %v1515_v2  ;;  %v1697_v18 = vadd.f32 %v1696_v17, %v1515_v2  ;;  %v2802_v19 = vpop.f32.mrb[9].mxu1  ;;  %v2808_v20 = vpop.f32.mrb[13].mxu0 }
 0x46e   : > { %v1653_v21 = vpop.f32.mrb[10].mxu1  ;;  %v1699_v22 = vpop.f32.mrb[14].mxu0 }
 0x46f   : > { %v2803_v24 = vpop.f32.mrb[11].mxu1  ;;  %v2809_v25 = vpop.f32.mrb[15].mxu0  ;;  %v1708_v26 = vsel %vm1517_vm3, %v1651_v33, -inf  ;;  %v1711_v27 = vsel %vm1517_vm3, %v1697_v18, -inf }
 0x470   : > { %1709 = vmax.xlane.f32.xlu0 %v1708_v26  ;;  %1712 = vmax.xlane.f32.xlu1 %v1711_v27 }
 0x4f5   : > { %v1704_v28 = vpop.xlane.xlu1 %1703  ;;  %v1707_v23 = vpop.xlane.xlu0 %1706 }
 0x4f6   : > { %v1714_v29 = vsub.f32 %v1559_v6, %v1704_v28  ;;  %v1715_v30 = vsub.f32 %v1605_v7, %v1707_v23 }
 0x4f8   : > { %v1718_v31 = vmul.f32 1.442695, %v1714_v29  ;;  %v1720_v32 = vmul.f32 1.442695, %v1715_v30 }
 0x4fa   : > { %3117 = vpow2.f32 %v1718_v31 }
 0x4fb   : > { %3119 = vpow2.f32 %v1720_v32 }
 0x4fd   : > { %v1710_v34 = vpop.xlane.xlu0 %1709  ;;  %v1713_v35 = vpop.xlane.xlu1 %1712 }
 0x4fe   : > { %v1716_v36 = vsub.f32 %v1651_v33, %v1710_v34  ;;  %v1717_v38 = vsub.f32 %v1697_v18, %v1713_v35 }
 0x500   : > { %v1722_v39 = vmul.f32 1.442695, %v1716_v36  ;;  %v1724_v40 = vmul.f32 1.442695, %v1717_v38  ;;  %v3109_v36 = vld [vmem:[#allocation18] sm:$0xff]  }
 0x502   : > { %3121 = vpow2.f32 %v1722_v39 }
 0x503   : > { %3123 = vpow2.f32 %v1724_v40 }
 0x504   : > { %v3118_v41 = vpop.eup %3117 }
 0x505   : > { %v3120_v44 = vpop.eup %3119  ;;  %v1726_v45 = vsel %vm1517_vm3, %v3118_v41, 0.0  ;;  %v1738_v46 = vpack.c.bf16 %v3118_v41, %v3118_v41 }
 0x506   : > { %1727 = vadd.xlane.f32.xlu0 %v1726_v45  ;;  %v1729_v48 = vsel %vm1517_vm3, %v3120_v44, 0.0  ;;  %v1739_v49 = vpack.c.bf16 %v3120_v44, %v3120_v44 }
 0x507   : > { %1730 = vadd.xlane.f32.xlu1 %v1729_v48  ;;  %2813 = vmatmul.mubr.msk.bf16.vlgmr.msra.gmra.mrb[12].mxu1 %vm1517_vm3, %v1738_v46 }
 0x508   : > { %2819 = vmatmul.mubr.msk.bf16.vlgmr.msra.gmra.mrb[16].mxu0 %vm1517_vm3, %v1739_v49  ;;  %2823 = vmatpush3.bf16.msra.mxu1 %v1843_v50 }
 0x509   : > { %2829 = vmatpush3.bf16.msra.mxu0 %v1889_v51  ;;  %2824 = vmatprep.mubr.msk.bf16.mxu1 %vm3790_vm0, %v3789_v0 }
 0x50a   : > { %2830 = vmatprep.mubr.msk.bf16.mxu0 %vm3790_vm0, %v3789_v0  ;;  %2834 = vmatprep.subr.bf16.mxu1 %v3789_v0 }
 0x50b   : > { %2842 = vmatprep.subr.bf16.mxu0 %v3789_v0 }
 0x50c   : > { %v3122_v52 = vpop.eup %3121 }
 0x50d   : > { %v3124_v53 = vpop.eup %3123  ;;  %v1732_v54 = vsel %vm1517_vm3, %v3122_v52, 0.0  ;;  %v1740_v55 = vpack.c.bf16 %v3122_v52, %v3122_v52 }
 0x50e   : > { %1733 = vadd.xlane.f32.xlu0 %v1732_v54  ;;  %v1735_v56 = vsel %vm1517_vm3, %v3124_v53, 0.0  ;;  %v1741_v57 = vpack.c.bf16 %v3124_v53, %v3124_v53 }
 0x50f   : > { %1736 = vadd.xlane.f32.xlu1 %v1735_v56  ;;  %2825 = vmatmul.mubr.msk.bf16.vlgmr.msra.gmra.mrb[16].mxu1 %vm1517_vm3, %v1740_v55 }
 0x510   : > { %2831 = vmatmul.mubr.msk.bf16.vlgmr.msra.gmra.mrb[20].mxu0 %vm1517_vm3, %v1741_v57  ;;  %2838 = vmatprep.mubr.msk.bf16.mxu1 %vm3790_vm0, %v3789_v0 }
 0x511   : > { %2846 = vmatprep.mubr.msk.bf16.mxu0 %vm3790_vm0, %v3789_v0  ;;  %2835 = vmatpush3.bf16.msra.mxu1 %v3109_v36 }
 0x512   : > { %2836 = vmatprep.subr.bf16.mxu1 %v3789_v0 }
 0x515   : > { %2837 = vmatpush3.bf16.msra.mxu1 %v3110_v47 }
 0x516   : > { %2850 = vmatprep.subr.bf16.mxu1 %v3789_v0 }
 0x593   : > { %v1728_v58 = vpop.xlane.xlu0 %1727 }
 0x594   : > { %v1731_v59 = vpop.xlane.xlu1 %1730  ;;  %3125 = vrcp.f32 %v1728_v58 }
 0x595   : > { %3127 = vrcp.f32 %v1731_v59 }
 0x59b   : > { %v1734_v60 = vpop.xlane.xlu0 %1733 }
 0x59c   : > { %v1737_v61 = vpop.xlane.xlu1 %1736  ;;  %3129 = vrcp.f32 %v1734_v60 }
 0x59d   : > { %3131 = vrcp.f32 %v1737_v61 }
 0x59e   : > { %v3126_v8 = vpop.eup %3125 }
 0x59f   : > { %v3128_v9 = vpop.eup %3127 }
 0x5a6   : > { %v3130_v10 = vpop.eup %3129 }
 0x5a7   : > { %v3132_v12 = vpop.eup %3131 }
 0x5da   : > { %v1787_v62 = vpop.f32.mrb[12].mxu1 }
 0x5db   : > { %v1833_v63 = vpop.f32.mrb[16].mxu0  ;;  %v2814_v1 = vpop.f32.mrb[13].mxu1  ;;  %v1935_v13 = vmul.f32 %v3126_v8, %v1787_v62 }
 0x5dc   : > { %v2820_v2 = vpop.f32.mrb[17].mxu0  ;;  %v1790_v4 = vpop.f32.mrb[14].mxu1  ;;  %v1936_v17 = vmul.f32 %v3128_v9, %v1833_v63 }
 0x5dd   : > { %v1836_v5 = vpop.f32.mrb[18].mxu0  ;;  %v2815_v6 = vpop.f32.mrb[15].mxu1 }
 0x5de   : > { %v2821_v7 = vpop.f32.mrb[19].mxu0 }
 0x5df   : > { %v2704_v7 = vld [vmem:[#allocation19] ss:$0 sm:$0xff] }
 0x5e2   : > { %v1879_v11 = vpop.f32.mrb[16].mxu1 }
 0x5e3   : > { %v1937_v14 = vmul.f32 %v3130_v10, %v1879_v11  ;;  %v1925_v15 = vpop.f32.mrb[20].mxu0  ;;  %v2826_v16 = vpop.f32.mrb[17].mxu1 }
 0x5e4   : > { %v1938_v33 = vmul.f32 %v3132_v12, %v1925_v15  ;;  %v2832_v18 = vpop.f32.mrb[21].mxu0  ;;  %v1882_v19 = vpop.f32.mrb[18].mxu1 }
 0x5e5   : > { %v1939_v20 = vcombine.low %v1935_v13, %v1937_v14  ;;  %v1940_v21 = vcombine.high %v1935_v13, %v1937_v14  ;;  %v1928_v22 = vpop.f32.mrb[22].mxu0  ;;  %v2827_v24 = vpop.f32.mrb[19].mxu1  ;;  %v3111_v19 = vld [vmem:[#allocation24] sm:$0xff]  }
 0x5e6   : > { %v1955_v25 = vcombine.low %v1936_v17, %v1938_v33  ;;  %v1956_v26 = vcombine.high %v1936_v17, %v1938_v33  ;;  %v2833_v27 = vpop.f32.mrb[23].mxu0  ;;  %2843 = vmatpush3.bf16.msra.mxu0 %v3111_v19  ;;  %v3114_v22 = vld [vmem:[#allocation27 + $0x8] sm:$0xff]  }
 0x5e7   : > { %v1947_v28 = vrot.slane %v1939_v20, %v4468_v37  ;;  %v1954_v23 = vrot.slane %v1940_v21, %v4468_v37  ;;  %v3112_v20 = vld [vmem:[#allocation24 + $0x8] sm:$0xff]   ;;  %2844 = vmatprep.subr.bf16.mxu0 %v3789_v0  ;;  %v3113_v21 = vld [vmem:[#allocation27] sm:$0xff]   ;;  %v2708_v27 = vld [vmem:[#allocation21] ss:$0 sm:$0xff] }
 0x5e8   : > { %v1963_v29 = vrot.slane %v1955_v25, %v4468_v37  ;;  %v1970_v30 = vrot.slane %v1956_v26, %v4468_v37 }
 0x5ea   : > { %v1971_v31 = vcombine.low %v1947_v28, %v1963_v29  ;;  %v1972_v32 = vcombine.high %v1947_v28, %v1963_v29  ;;  %v1987_v34 = vcombine.low %v1954_v23, %v1970_v30  ;;  %v1988_v35 = vcombine.high %v1954_v23, %v1970_v30  ;;  %2845 = vmatpush3.bf16.msra.mxu0 %v3112_v20  ;;  %v2709_v23 = vld [vmem:[#allocation22] ss:$0 sm:$0xff] }
 0x5ec   : > { %v1979_v38 = vrot.slane %v1971_v31, %v4471_v43  ;;  %v1986_v39 = vrot.slane %v1972_v32, %v4471_v43  ;;  %v1995_v40 = vrot.slane %v1987_v34, %v4471_v43  ;;  %v2002_v41 = vrot.slane %v1988_v35, %v4471_v43  ;;  %v3115_v32 = vld [vmem:[#allocation27 + $0x10] sm:$0xff]   ;;  %v3116_v34 = vld [vmem:[#allocation27 + $0x18] sm:$0xff]  }
 0x5ed   : > { %v2710_v35 = vld [vmem:[#allocation25] ss:$0 sm:$0xff] }
 0x5ee   : > { %v2007_v42 = vcombine.low %v1979_v38, %v1986_v39  ;;  %v2702_v44 = vcombine.high %v1979_v38, %v1986_v39  ;;  %v2023_v45 = vcombine.low %v1995_v40, %v2002_v41  ;;  %v2703_v46 = vcombine.high %v1995_v40, %v2002_v41 }
 0x5f0   : > { %v2014_v48 = vrot.slane %v2007_v42, %v4468_v37  ;;  %v2022_v49 = vrot.slane %v2702_v44, %v4468_v37  ;;  %v2030_v50 = vrot.slane %v2023_v45, %v4468_v37  ;;  %v2038_v51 = vrot.slane %v2703_v46, %v4468_v37  ;;  %v2714_v45 = vld [vmem:[#allocation28] ss:$0 sm:$0xff] }
 0x5f2   : > { %v2040_v52 = vcombine.high %v2014_v48, %v2022_v49  ;;  %v2056_v53 = vcombine.high %v2030_v50, %v2038_v51  ;;  %v2039_v54 = vcombine.low %v2014_v48, %v2022_v49  ;;  %v2055_v55 = vcombine.low %v2030_v50, %v2038_v51 }
 0x5f4   : > { %v2054_v56 = vrot.slane %v2040_v52, %v4471_v43  ;;  %v2070_v57 = vrot.slane %v2056_v53, %v4471_v43  ;;  %v2047_v58 = vrot.slane %v2039_v54, %v4471_v43  ;;  %v2063_v59 = vrot.slane %v2055_v55, %v4471_v43 }
 0x5f6   : > { %v2073_v60 = vcombine.low %v2054_v56, %v2070_v57  ;;  %v2072_v61 = vcombine.high %v2047_v58, %v2063_v59  ;;  %v2074_v62 = vcombine.high %v2054_v56, %v2070_v57  ;;  %v2071_v63 = vcombine.low %v2047_v58, %v2063_v59 }
 0x5f8   : > { %2080 = vrot.lane.b32.xlu1 %v2073_v60, %s3796_s11  ;;  %2076 = vrot.lane.b32.xlu0 %v2072_v61, %s3797_s28  ;;  %v2720_v61 = vld [vmem:[#allocation30] ss:$0 sm:$0xff]  ;;  %s3645_s11 = scalar_lea.vmem %s4622_s3, 128  ;;  %s3649_s28 = sshll.u32 %s3799_s27, 4  ;;  %s3650_s28 = int_to_ptr.vmem [resolvable:$false] %s3649_s28 }
 0x5f9   : > { %p3646_p6 = scmp.ne.s32.totalorder %s4622_s3, %s3645_s11  ;;  %p3652_p12 = scmp.lt.s32.totalorder %s4622_s3, %s3650_s28 }
 0x5fb   : > { %p3647_p8 = pnand %p3646_p6, %p4322_p10 }
 0x5fc   : > { %2084 = vrot.lane.b32.xlu1 %v2074_v62, %s3798_s22  ;;  %s3651_s22 = scalar_lea.vmem %s3650_s28, 256 }
 0x5fd   : > { %p3648_p11 = pneg %p3647_p8  ;;  %p3653_p0 = scmp.lt.s32.totalorder %s3651_s22, %s3645_s11 }
 0x5ff   : > { %p3654_p5 = por %p3653_p0, %p3652_p12 }
 0x601   : > { %p3655_p3 = pnand %p3654_p5, %p3648_p11 }
 0x66a   : > { %v2081_v37 = vpop.permute.xlu1 %2080  ;;  %v2077_v1 = vpop.permute.xlu0 %2076 }
 0x66b   : > { %v2087_v2 = vsel %vm1517_vm3, %v2071_v63, %v2077_v1  ;;  %v2721_v63 = vld [vmem:[#allocation31] ss:$0 sm:$0xff] }
 0x66c   : > { %v2089_v5 = vsel %vm2088_vm5, %v2087_v2, %v2081_v37 }
 0x66e   : > { %v2085_v4 = vpop.permute.xlu1 %2084 }
 0x66f   : > { %v2091_v6 = vsel %vm2090_vm6, %v2089_v5, %v2085_v4 }
 0x670   : > { %v2092_v43 = vpack.c.bf16 %v2091_v6, %v2091_v6 }
 0x672   : > { %2839 = vmatmul.mubr.msk.bf16.vlgmr.msra.gmra.mrb[20].mxu1 %vm867_vm1, %v2092_v43 }
 0x673   : > { %2858 = vmatprep.mubr.msk.bf16.mxu1 %vm3790_vm0, %v3789_v0  ;;  %2851 = vmatpush3.bf16.msra.mxu1 %v3113_v21 }
 0x674   : > { %2852 = vmatprep.subr.bf16.mxu1 %v3789_v0 }
 0x677   : > { %2853 = vmatpush3.bf16.msra.mxu1 %v3114_v22 }
 0x678   : > { %2854 = vmatprep.subr.bf16.mxu1 %v3789_v0 }
 0x67b   : > { %2855 = vmatpush3.bf16.msra.mxu1 %v3115_v32 }
 0x67c   : > { %2856 = vmatprep.subr.bf16.mxu1 %v3789_v0 }
 0x67f   : > { %2857 = vmatpush3.bf16.msra.mxu1 %v3116_v34 }
 0x745   : > { %v2153_v8 = vpop.f32.mrb[20].mxu1 }
 0x746   : > { %v2154_v9 = vadd.f32 %v2704_v7, %v2153_v8  ;;  %v2840_v10 = vpop.f32.mrb[21].mxu1 }
 0x747   : > { %v2156_v11 = vpop.f32.mrb[22].mxu1 }
 0x748   : > { %v2841_v12 = vpop.f32.mrb[23].mxu1  ;;  %v2159_v13 = vadd.f32 %v2154_v9, %v4436_v3 }
 0x74a   : > { %v2162_v14 = vsel %vm867_vm1, %v2159_v13, 0.0 }
 0x74b   : > { %2163 = vadd.xlane.f32.xlu0 %v2162_v14 }
 0x7d8   : > { %v2164_v15 = vpop.xlane.xlu0 %2163 }
 0x7d9   : > { %v2166_v16 = vmul.f32 0.03125, %v2164_v15 }
 0x7db   : > { %v2167_v17 = vsub.f32 %v2159_v13, %v2166_v16 }
 0x7dd   : > { %v2168_v33 = vmul.f32 %v2167_v17, %v2167_v17 }
 0x7df   : > { %v2169_v18 = vsel %vm867_vm1, %v2168_v33, 0.0 }
 0x7e0   : > { %2170 = vadd.xlane.f32.xlu1 %v2169_v18 }
 0x86d   : > { %v2171_v3 = vpop.xlane.xlu1 %2170 }
 0x86e   : > { %v2172_v24 = vmul.f32 0.03125, %v2171_v3 }
 0x870   : > { %v2173_v25 = vadd.f32 1e-06, %v2172_v24 }
 0x872   : > { %3133 = vrsqrt.f32 %v2173_v25 }
 0x87c   : > { %v3134_v26 = vpop.eup %3133 }
 0x87d   : > { %v2175_v28 = vmul.f32 %v3134_v26, %v2167_v17 }
 0x87f   : > { %v2182_v29 = vmul.f32 %v2708_v27, %v2175_v28 }
 0x881   : > { %v2189_v30 = vadd.f32 %v2709_v23, %v2182_v29 }
 0x883   : > { %v2190_v31 = vpack.c.bf16 %v2189_v30, %v2189_v30 }
 0x885   : > { %2847 = vmatmul.mubr.msk.bf16.vlgmr.msra.gmra.mrb[24].mxu0 %vm867_vm1, %v2190_v31 }
 0x958   : > { %v2251_v36 = vpop.f32.mrb[24].mxu0 }
 0x959   : > { %v2252_v38 = vadd.f32 %v2710_v35, %v2251_v36  ;;  %v2848_v39 = vpop.f32.mrb[25].mxu0 }
 0x95a   : > { %v2254_v40 = vpop.f32.mrb[26].mxu0 }
 0x95b   : > { %v2257_v41 = vmax.f32 %v2252_v38, 0.0  ;;  %v2849_v42 = vpop.f32.mrb[27].mxu0 }
 0x95d   : > { %v2258_v44 = vpack.c.bf16 %v2257_v41, %v2257_v41 }
 0x95f   : > { %2859 = vmatmul.mubr.msk.bf16.vlgmr.msra.gmra.mrb[24].mxu1 %vm2298_vm7, %v2258_v44 }
 0xa32   : > { %v2336_v46 = vpop.f32.mrb[24].mxu1 }
 0xa33   : > { %v2337_v47 = vadd.f32 %v2714_v45, %v2336_v46  ;;  %v2860_v48 = vpop.f32.mrb[25].mxu1 }
 0xa34   : > { %v2339_v49 = vpop.f32.mrb[26].mxu1 }
 0xa35   : > { %v2861_v50 = vpop.f32.mrb[27].mxu1  ;;  %v2342_v51 = vadd.f32 %v2337_v47, %v2189_v30 }
 0xa37   : > { %v2345_v0 = vsel %vm867_vm1, %v2342_v51, 0.0 }
 0xa38   : > { %2346 = vadd.xlane.f32.xlu0 %v2345_v0 }
 0xac5   : > { %v2347_v52 = vpop.xlane.xlu0 %2346 }
 0xac6   : > { %v2348_v53 = vmul.f32 0.03125, %v2347_v52 }
 0xac8   : > { %v2349_v54 = vsub.f32 %v2342_v51, %v2348_v53 }
 0xaca   : > { %v2350_v55 = vmul.f32 %v2349_v54, %v2349_v54 }
 0xacc   : > { %v2351_v56 = vsel %vm867_vm1, %v2350_v55, 0.0 }
 0xacd   : > { %2352 = vadd.xlane.f32.xlu0 %v2351_v56 }
 0xb5a   : > { %v2353_v57 = vpop.xlane.xlu0 %2352 }
 0xb5b   : > { %v2354_v58 = vmul.f32 0.03125, %v2353_v57 }
 0xb5d   : > { %v2355_v59 = vadd.f32 1e-06, %v2354_v58 }
 0xb5f   : > { %3135 = vrsqrt.f32 %v2355_v59 }
 0xb69   : > { %v3136_v60 = vpop.eup %3135 }
 0xb6a   : > { %v2357_v62 = vmul.f32 %v3136_v60, %v2349_v54 }
 0xb6c   : > { %v2364_v37 = vmul.f32 %v2720_v61, %v2357_v62 }
 0xb6e   : > { %v2371_v1 = vadd.f32 %v2721_v63, %v2364_v37 }
 0xb70   : > { %2372 = vst.msk [vmem:[%s836_s9] sm:$0xff] %vm867_vm1, %v2371_v1 }
 0xb71   : > { %3658 = shalt.err (!%p3655_p3)
}
 0xb72   : > { %s3659_s30 = scalar_lea.hbm %s4620_s19, 128  ;;  %s3663_s9 = scalar_lea.hbm %s4762_s1, 256 }
 0xb73   : > { %p3660_p9 = scmp.ne.s32.totalorder %s4620_s19, %s3659_s30  ;;  %p3664_p7 = scmp.lt.u32.totalorder %s4620_s19, %s4762_s1 }
 0xb74   : > { %p3665_p13 = scmp.lt.u32.totalorder %s3663_s9, %s3659_s30  ;;  %p3667_p6 = scmp.lt.u32.totalorder %s3659_s30, %s4620_s19 }
 0xb75   : > { %p3661_p4 = pnand %p3660_p9, %p4322_p10 }
 0xb76   : > { %p3666_p2 = por %p3665_p13, %p3664_p7 }
 0xb77   : > { %p3662_p1 = pneg %p3661_p4 }
 0xb78   : > { %p3668_p8 = por %p3667_p6, %p3666_p2 }
 0xb7a   : > { %p3669_p11 = pnand %p3668_p8, %p3662_p1 }
 0xb7c   : > { %3672 = shalt.err (!%p3669_p11)
}
 0xb7d   : > { %2930 = dma.vmem_to_hbm [thread:$0]  (%p4322_p10), %s4622_s3, 128, %s4620_s19, %s2374_s23  }
 0xb7e PF: > { %s4763_s11 = sld [smem:[#allocation46_spill]]  ;;  %s4764_s27 = sld [smem:[#allocation53_spill]] }
 0xb7f   : > { %s4765_s28 = sld [smem:[#allocation49_spill]] }
 0xb84   : > { %s2400_s22 = sand.u32 1, %s4763_s11   ;;  %p4766_p12 = scmp.ne.s32.totalorder %s4764_s27, 0 }
 0xb85   : > { %p4767_p0 = scmp.ge.s32.totalorder %s4765_s28, 2  ;;  %s2401_s7 = scalar_lea.sflag [#allocation6], %s2400_s22 }
 0xb87   : > { %p2989_p5 = pnand %p4767_p0, %p4766_p12 }
 0xb89   : > { %3742 = dma.done.wait (!%p2989_p5), %s2401_s7, 128  }
 0xb8a   : > { %3744 = vsyncadd (!%p2989_p5), %s2401_s7, 4294967168  ;;  %s43_s19 = sadd.s32 1, %s4765_s28   ;;  %s4768_s27 = sld [smem:[#allocation47_spill]] }
 0xb8b   : > { %p40_p3 = scmp.ge.s32.totalorder %s43_s19, 4   ;;  %s4769_s28 = smov %s3755_s29 }
 0xb8c   : > { %s4770_s29 = smov %s4334_s18  ;;  %s4771_s30 = smov %s3763_s0 }
 0xb8d   : > { %s4772_s0 = smov %s4774_s25  ;;  %42 = sbr.rel (!%p40_p3) target bundleno = 25 (0x19), region = 211 }
 0xb94   :  { %2406 = vsyncpa [#allocation5], 1 }
 0xb95   :  { %2408 = vsyncpa [#allocation5 + $0x1], 1 }
 0xb96   :  { %2409 = vsyncpa [#allocation8], 1 }
 0xb97   :  { %2410 = vsyncpa [#allocation11], 1 }
 0xb98   :  { %2411 = vsyncpa [#allocation14], 1 }
 0xb99   :  { %2412 = vsyncpa [#allocation17], 1 }
 0xb9a   :  { %2413 = vsyncpa [#allocation20], 1 }
 0xb9b   :  { %2414 = vsyncpa [#allocation23], 1 }
 0xb9c   :  { %2415 = vsyncpa [#allocation26], 1 }
 0xb9d   :  { %2416 = vsyncpa [#allocation29], 1 }
 0xb9e   :  { %2417 = vsyncpa [#allocation32], 1 }
 0xb9f   :  { %2418 = vsyncpa [#allocation6], 1 }
 0xba0   :  { %2420 = vsyncpa [#allocation6 + $0x1], 1 }

</bundles_post_ra>
